<compile_context>
chip_gen: v5e
topology: v5e:2x2
jax: 0.10.0
libtpu: 0.0.40
codegen_flags: <defaults>
</compile_context>

<pallas_src>
import functools

import jax
import jax.numpy as jnp
from jax.experimental import pallas as pl
from jax.experimental.pallas import tpu as pltpu

# ----------------------- small CLIP text-transformer config -----------------
L = 8              # context length
D = 32             # transformer width
HEADS = 2
HD = D // HEADS    # head dim
LAYERS = 2
MLP = 4 * D
EMBED = 32         # text_projection output dim
EMBED_PAD = 128    # lane-dense padded output width
EPS = 1e-5
BLOCK_B = 1        # batch rows per grid step (parallel axis)


# ------------------------------- fused kernel -------------------------------
def _text_encoder_kernel(
    prompts_ref, tok_ref, pos_ref,
    ln1_g_ref, ln1_b_ref,
    wqkv_ref, bqkv_ref, wo_ref, bo_ref,
    ln2_g_ref, ln2_b_ref,
    wfc_ref, bfc_ref, wpr_ref, bpr_ref,
    lnf_g_ref, lnf_b_ref, proj_ref,
    out_ref,
):
    f32 = jnp.float32
    bf16 = jnp.bfloat16
    BL = BLOCK_B * L

    def layer_norm(x, g, b):
        mu = jnp.mean(x, axis=-1, keepdims=True)
        var = jnp.mean(jnp.square(x - mu), axis=-1, keepdims=True)
        return (x - mu) * jax.lax.rsqrt(var + EPS) * g + b

    # x = prompts + positional_embedding   (batch-major; reference permute(1,0,2) is
    # layout-only for nn.MultiheadAttention, so we stay batch-major).
    x = (prompts_ref[...] + pos_ref[...][None]).reshape(BL, D).astype(f32)

    # Causal additive mask, built ONCE (hoisted out of the unrolled loops).
    row = jax.lax.broadcasted_iota(jnp.int32, (L, L), 0)
    col = jax.lax.broadcasted_iota(jnp.int32, (L, L), 1)
    causal = jnp.where(col <= row, 0.0, -1e9).astype(f32)[None]     # [1, L, L]

    for li in range(LAYERS):            # static unroll; all weights stay in VMEM
        # ---- pre-attention LayerNorm ----
        h = layer_norm(x, ln1_g_ref[li], ln1_b_ref[li])              # [BL, D] f32

        # ---- fused QKV projection: one [BL, D] x [D, 3D] matmul (scale folded into Wq) ----
        qkv = jnp.dot(h.astype(bf16), wqkv_ref[li],
                      preferred_element_type=f32) + bqkv_ref[li]     # [BL, 3D] f32
        q = qkv[:, 0 * D:1 * D].reshape(BLOCK_B, L, D)
        k = qkv[:, 1 * D:2 * D].reshape(BLOCK_B, L, D)
        v = qkv[:, 2 * D:3 * D].reshape(BLOCK_B, L, D)

        # ---- per-head attention (cheap lane slices of the fused result) ----
        o_heads = []
        for hi in range(HEADS):
            qh = q[:, :, hi * HD:(hi + 1) * HD]
            kh = k[:, :, hi * HD:(hi + 1) * HD]
            vh = v[:, :, hi * HD:(hi + 1) * HD]
            s = jnp.einsum("bqd,bkd->bqk", qh.astype(bf16), kh.astype(bf16),
                           preferred_element_type=f32)               # [B, L, L]
            s = s + causal
            s = s - jnp.max(s, axis=-1, keepdims=True)
            p = jnp.exp(s)
            p = p * pl.reciprocal(jnp.sum(p, axis=-1, keepdims=True), approx=True)
            o_heads.append(jnp.einsum("bqk,bkd->bqd", p.astype(bf16), vh.astype(bf16),
                                      preferred_element_type=f32))   # [B, L, HD]
        o = jnp.concatenate(o_heads, axis=-1).reshape(BL, D)         # [BL, D] f32

        # ---- single fused output projection ----
        attn = jnp.dot(o.astype(bf16), wo_ref[li],
                       preferred_element_type=f32) + bo_ref[li]
        x = x + attn

        # ---- pre-MLP LayerNorm + QuickGELU MLP ----
        h = layer_norm(x, ln2_g_ref[li], ln2_b_ref[li])
        h = jnp.dot(h.astype(bf16), wfc_ref[li],
                    preferred_element_type=f32) + bfc_ref[li]
        h = h * jax.nn.sigmoid(1.702 * h)                            # QuickGELU (f32 EUP)
        h = jnp.dot(h.astype(bf16), wpr_ref[li],
                    preferred_element_type=f32) + bpr_ref[li]
        x = x + h

    # ---- EOT gather: x[b, tokenized_prompts[b].argmax(-1)] (first-argmax semantics) ----
    b = pl.program_id(0)                       # BLOCK_B == 1 -> grid index == batch row
    best_val = tok_ref[b, 0]
    best_idx = jnp.int32(0)
    for l in range(1, L):                      # tiny static scalar loop over SMEM
        v = tok_ref[b, l]
        take = v > best_val
        best_val = jnp.where(take, v, best_val)
        best_idx = jnp.where(take, jnp.int32(l), best_idx)

    lane = jax.lax.broadcasted_iota(jnp.int32, (1, L), 1)
    onehot = (lane == best_idx).astype(f32)                          # [1, L]
    eot = jnp.dot(onehot, x, preferred_element_type=f32)             # [1, D] row pick

    # ln_final is per-token, so applying it only to the gathered token is exact.
    eot = layer_norm(eot, lnf_g_ref[...], lnf_b_ref[...])
    res = jnp.dot(eot.astype(bf16), proj_ref[...],
                  preferred_element_type=f32)                        # [1, EMBED_PAD]
    out_ref[...] = res.reshape(BLOCK_B, 1, EMBED_PAD)


# ------------------------------ wrapper --------------------------------------
def _resident_spec(arr):
    """Full-array block with a constant index map -> stays VMEM-resident across grid steps."""
    nd = arr.ndim
    return pl.BlockSpec(arr.shape, lambda i, _nd=nd: (0,) * _nd)


def text_encoder_forward(params, prompts, tokenized_prompts):
    B = prompts.shape[0]
    assert B % BLOCK_B == 0

    prompts = prompts.astype(jnp.float32)
    tok = tokenized_prompts.astype(jnp.int32)

    weight_args = (
        params["pos_emb"],
        params["ln1_g"], params["ln1_b"],
        params["wqkv"], params["bqkv"], params["wo"], params["bo"],
        params["ln2_g"], params["ln2_b"],
        params["wfc"], params["bfc"], params["wpr"], params["bpr"],
        params["lnf_g"], params["lnf_b"], params["proj"],
    )

    in_specs = [
        pl.BlockSpec((BLOCK_B, L, D), lambda i: (i, 0, 0)),              # prompts (per batch tile)
        pl.BlockSpec(memory_space=pltpu.MemorySpace.SMEM),               # tokenized_prompts (SMEM)
    ] + [_resident_spec(w) for w in weight_args]                          # all weights resident

    out = pl.pallas_call(
        _text_encoder_kernel,
        grid=(pl.cdiv(B, BLOCK_B),),
        out_shape=jax.ShapeDtypeStruct((B, 1, EMBED_PAD), jnp.float32),
        in_specs=in_specs,
        out_specs=pl.BlockSpec((BLOCK_B, 1, EMBED_PAD), lambda i: (i, 0, 0)),
        compiler_params=pltpu.CompilerParams(dimension_semantics=("parallel",)),
    )(prompts, tok, *weight_args)

    return out[:, 0, :EMBED]                                             # un-pad lanes outside


# ---------------------------- parameter init / static prep -------------------
def init_params(key):
    ks = jax.random.split(key, 8)

    def nrm(k, shape, std=0.02):
        return std * jax.random.normal(k, shape, jnp.float32)

    return dict(
        pos_emb=nrm(ks[0], (L, D)),
        wq=nrm(ks[1], (LAYERS, D, D)), bq=jnp.zeros((LAYERS, 1, D), jnp.float32),
        wk=nrm(ks[2], (LAYERS, D, D)), bk=jnp.zeros((LAYERS, 1, D), jnp.float32),
        wv=nrm(ks[3], (LAYERS, D, D)), bv=jnp.zeros((LAYERS, 1, D), jnp.float32),
        wo=nrm(ks[4], (LAYERS, D, D)), bo=jnp.zeros((LAYERS, 1, D), jnp.float32),
        ln1_g=jnp.ones((LAYERS, 1, D), jnp.float32), ln1_b=jnp.zeros((LAYERS, 1, D), jnp.float32),
        ln2_g=jnp.ones((LAYERS, 1, D), jnp.float32), ln2_b=jnp.zeros((LAYERS, 1, D), jnp.float32),
        wfc=nrm(ks[5], (LAYERS, D, MLP)), bfc=jnp.zeros((LAYERS, 1, MLP), jnp.float32),
        wpr=nrm(ks[6], (LAYERS, MLP, D)), bpr=jnp.zeros((LAYERS, 1, D), jnp.float32),
        lnf_g=jnp.ones((1, D), jnp.float32), lnf_b=jnp.zeros((1, D), jnp.float32),
        proj=nrm(ks[7], (D, EMBED)),
    )


def prepare_params(raw):
    """Static, zero-runtime-cost prep: fuse QKV, fold softmax scale into Wq/bq,
    cast matmul weights to bf16, pad text_projection to 128 lanes."""
    bf16 = jnp.bfloat16
    scale = 1.0 / (HD ** 0.5)
    wqkv = jnp.concatenate([raw["wq"] * scale, raw["wk"], raw["wv"]], axis=-1)   # [LAYERS, D, 3D]
    bqkv = jnp.concatenate([raw["bq"] * scale, raw["bk"], raw["bv"]], axis=-1)   # [LAYERS, 1, 3D]
    proj_pad = jnp.zeros((D, EMBED_PAD), jnp.float32).at[:, :EMBED].set(raw["proj"])
    return dict(
        pos_emb=raw["pos_emb"],
        ln1_g=raw["ln1_g"], ln1_b=raw["ln1_b"],
        wqkv=wqkv.astype(bf16), bqkv=bqkv,
        wo=raw["wo"].astype(bf16), bo=raw["bo"],
        ln2_g=raw["ln2_g"], ln2_b=raw["ln2_b"],
        wfc=raw["wfc"].astype(bf16), bfc=raw["bfc"],
        wpr=raw["wpr"].astype(bf16), bpr=raw["bpr"],
        lnf_g=raw["lnf_g"], lnf_b=raw["lnf_b"],
        proj=proj_pad.astype(bf16),
    )


if __name__ == "__main__":
    key = jax.random.PRNGKey(0)
    k_prompts, k_params = jax.random.split(key)

    batch = 2
    # `prompts` are already-embedded (learned-context + class) token embeddings.
    prompts = 0.02 * jax.random.normal(k_prompts, (batch, L, D), jnp.float32)
    # Token ids; the EOT token (largest id) marks the row used for projection.
    tokenized_prompts = jnp.array(
        [[49406, 320, 1125, 539, 49407, 0, 0, 0],
         [49406, 320, 1125, 539, 320, 2368, 49407, 0]], dtype=jnp.int32)

    params = prepare_params(init_params(k_params))

    text_features = text_encoder_forward(params, prompts, tokenized_prompts)
    jax.block_until_ready(text_features)

    assert text_features.shape == (batch, EMBED)
    assert bool(jnp.all(jnp.isfinite(text_features)))
    print("KERNEL_OK")
</pallas_src>

<mosaic_0001>
module attributes {stable_mosaic.version = 11 : i64} {
  func.func @_text_encoder_kernel(%arg0: i32, %arg1: memref<1x8x32xf32, #tpu.memory_space<vmem>>, %arg2: memref<2x8xi32, #tpu.memory_space<smem>>, %arg3: memref<8x32xf32, #tpu.memory_space<vmem>>, %arg4: memref<2x1x32xf32, #tpu.memory_space<vmem>>, %arg5: memref<2x1x32xf32, #tpu.memory_space<vmem>>, %arg6: memref<2x32x96xbf16, #tpu.memory_space<vmem>>, %arg7: memref<2x1x96xf32, #tpu.memory_space<vmem>>, %arg8: memref<2x32x32xbf16, #tpu.memory_space<vmem>>, %arg9: memref<2x1x32xf32, #tpu.memory_space<vmem>>, %arg10: memref<2x1x32xf32, #tpu.memory_space<vmem>>, %arg11: memref<2x1x32xf32, #tpu.memory_space<vmem>>, %arg12: memref<2x32x128xbf16, #tpu.memory_space<vmem>>, %arg13: memref<2x1x128xf32, #tpu.memory_space<vmem>>, %arg14: memref<2x128x32xbf16, #tpu.memory_space<vmem>>, %arg15: memref<2x1x32xf32, #tpu.memory_space<vmem>>, %arg16: memref<1x32xf32, #tpu.memory_space<vmem>>, %arg17: memref<1x32xf32, #tpu.memory_space<vmem>>, %arg18: memref<32x128xbf16, #tpu.memory_space<vmem>>, %arg19: memref<1x1x128xf32, #tpu.memory_space<vmem>>) attributes {dimension_semantics = [#tpu.dimension_semantics<parallel>], iteration_bounds = array<i64: 2>, scalar_prefetch = 0 : i64, scratch_operands = 0 : i64, tpu.core_type = #tpu.core_type<tc>, window_params = [{transform_indices = @transform_0, window_bounds = array<i64: 1, 8, 32>}, {transform_indices = @transform_1, window_bounds = array<i64: 2, 8>}, {pipeline_mode = #tpu.pipeline_mode<synchronous>, transform_indices = @transform_2, window_bounds = array<i64: 8, 32>}, {pipeline_mode = #tpu.pipeline_mode<synchronous>, transform_indices = @transform_3, window_bounds = array<i64: 2, 1, 32>}, {pipeline_mode = #tpu.pipeline_mode<synchronous>, transform_indices = @transform_4, window_bounds = array<i64: 2, 1, 32>}, {pipeline_mode = #tpu.pipeline_mode<synchronous>, transform_indices = @transform_5, window_bounds = array<i64: 2, 32, 96>}, {pipeline_mode = #tpu.pipeline_mode<synchronous>, transform_indices = @transform_6, window_bounds = array<i64: 2, 1, 96>}, {pipeline_mode = #tpu.pipeline_mode<synchronous>, transform_indices = @transform_7, window_bounds = array<i64: 2, 32, 32>}, {pipeline_mode = #tpu.pipeline_mode<synchronous>, transform_indices = @transform_8, window_bounds = array<i64: 2, 1, 32>}, {pipeline_mode = #tpu.pipeline_mode<synchronous>, transform_indices = @transform_9, window_bounds = array<i64: 2, 1, 32>}, {pipeline_mode = #tpu.pipeline_mode<synchronous>, transform_indices = @transform_10, window_bounds = array<i64: 2, 1, 32>}, {pipeline_mode = #tpu.pipeline_mode<synchronous>, transform_indices = @transform_11, window_bounds = array<i64: 2, 32, 128>}, {pipeline_mode = #tpu.pipeline_mode<synchronous>, transform_indices = @transform_12, window_bounds = array<i64: 2, 1, 128>}, {pipeline_mode = #tpu.pipeline_mode<synchronous>, transform_indices = @transform_13, window_bounds = array<i64: 2, 128, 32>}, {pipeline_mode = #tpu.pipeline_mode<synchronous>, transform_indices = @transform_14, window_bounds = array<i64: 2, 1, 32>}, {pipeline_mode = #tpu.pipeline_mode<synchronous>, transform_indices = @transform_15, window_bounds = array<i64: 1, 32>}, {pipeline_mode = #tpu.pipeline_mode<synchronous>, transform_indices = @transform_16, window_bounds = array<i64: 1, 32>}, {pipeline_mode = #tpu.pipeline_mode<synchronous>, transform_indices = @transform_17, window_bounds = array<i64: 32, 128>}, {transform_indices = @transform_18, window_bounds = array<i64: 1, 1, 128>}]} {
    %c0 = arith.constant 0 : index
    %c0_0 = arith.constant 0 : index
    %c0_1 = arith.constant 0 : index
    %0 = vector.load %arg1[%c0, %c0_0, %c0_1] : memref<1x8x32xf32, #tpu.memory_space<vmem>>, vector<1x8x32xf32>
    %c0_2 = arith.constant 0 : index
    %c0_3 = arith.constant 0 : index
    %1 = vector.load %arg3[%c0_2, %c0_3] : memref<8x32xf32, #tpu.memory_space<vmem>>, vector<8x32xf32>
    %2 = vector.shape_cast %1 : vector<8x32xf32> to vector<1x8x32xf32>
    %3 = arith.addf %0, %2 : vector<1x8x32xf32>
    %4 = vector.shape_cast %3 : vector<1x8x32xf32> to vector<8x32xf32>
    %5 = tpu.iota {dimensions = array<i32: 0>} : vector<8x8xi32>
    %6 = tpu.iota {dimensions = array<i32: 1>} : vector<8x8xi32>
    %7 = arith.cmpi sle, %6, %5 : vector<8x8xi32>
    %cst = arith.constant 0.000000e+00 : f32
    %cst_4 = arith.constant -1.000000e+09 : f32
    %8 = vector.broadcast %cst : f32 to vector<8x8xf32>
    %9 = vector.broadcast %cst_4 : f32 to vector<8x8xf32>
    %10 = arith.select %7, %8, %9 : vector<8x8xi1>, vector<8x8xf32>
    %11 = vector.shape_cast %10 : vector<8x8xf32> to vector<1x8x8xf32>
    %c0_5 = arith.constant 0 : index
    %c0_6 = arith.constant 0 : index
    %c0_7 = arith.constant 0 : index
    %12 = vector.load %arg4[%c0_5, %c0_6, %c0_7] : memref<2x1x32xf32, #tpu.memory_space<vmem>>, vector<1x1x32xf32>
    %13 = vector.shape_cast %12 : vector<1x1x32xf32> to vector<1x32xf32>
    %c0_8 = arith.constant 0 : index
    %c0_9 = arith.constant 0 : index
    %c0_10 = arith.constant 0 : index
    %14 = vector.load %arg5[%c0_8, %c0_9, %c0_10] : memref<2x1x32xf32, #tpu.memory_space<vmem>>, vector<1x1x32xf32>
    %15 = vector.shape_cast %14 : vector<1x1x32xf32> to vector<1x32xf32>
    %cst_11 = arith.constant dense<0.000000e+00> : vector<8xf32>
    %16 = vector.multi_reduction <add>, %4, %cst_11 [1] : vector<8x32xf32> to vector<8xf32>
    %17 = vector.shape_cast %16 : vector<8xf32> to vector<8x1xf32>
    %cst_12 = arith.constant 3.200000e+01 : f32
    %18 = vector.broadcast %cst_12 : f32 to vector<8x1xf32>
    %19 = arith.divf %17, %18 : vector<8x1xf32>
    %20 = vector.broadcast %19 : vector<8x1xf32> to vector<8x32xf32>
    %21 = arith.subf %4, %20 : vector<8x32xf32>
    %22 = arith.mulf %21, %21 : vector<8x32xf32>
    %cst_13 = arith.constant dense<0.000000e+00> : vector<8xf32>
    %23 = vector.multi_reduction <add>, %22, %cst_13 [1] : vector<8x32xf32> to vector<8xf32>
    %24 = vector.shape_cast %23 : vector<8xf32> to vector<8x1xf32>
    %cst_14 = arith.constant 3.200000e+01 : f32
    %25 = vector.broadcast %cst_14 : f32 to vector<8x1xf32>
    %26 = arith.divf %24, %25 : vector<8x1xf32>
    %27 = vector.broadcast %19 : vector<8x1xf32> to vector<8x32xf32>
    %28 = arith.subf %4, %27 : vector<8x32xf32>
    %cst_15 = arith.constant 9.99999974E-6 : f32
    %29 = vector.broadcast %cst_15 : f32 to vector<8x1xf32>
    %30 = arith.addf %26, %29 : vector<8x1xf32>
    %31 = math.rsqrt %30 : vector<8x1xf32>
    %32 = vector.broadcast %31 : vector<8x1xf32> to vector<8x32xf32>
    %33 = arith.mulf %28, %32 : vector<8x32xf32>
    %34 = vector.broadcast %13 : vector<1x32xf32> to vector<8x32xf32>
    %35 = arith.mulf %33, %34 : vector<8x32xf32>
    %36 = vector.broadcast %15 : vector<1x32xf32> to vector<8x32xf32>
    %37 = arith.addf %35, %36 : vector<8x32xf32>
    %38 = arith.truncf %37 : vector<8x32xf32> to vector<8x32xbf16>
    %c0_16 = arith.constant 0 : index
    %c0_17 = arith.constant 0 : index
    %c0_18 = arith.constant 0 : index
    %39 = vector.load %arg6[%c0_16, %c0_17, %c0_18] : memref<2x32x96xbf16, #tpu.memory_space<vmem>>, vector<1x32x96xbf16>
    %40 = vector.shape_cast %39 : vector<1x32x96xbf16> to vector<32x96xbf16>
    %cst_19 = arith.constant dense<0.000000e+00> : vector<8x96xf32>
    %41 = tpu.matmul %38, %40, %cst_19 {dimension_numbers = #tpu.dot_dimension_numbers<[1], [0], [0], [1], [0, 0, 1, 1], [], []>} : vector<8x32xbf16>, vector<32x96xbf16>, vector<8x96xf32> -> vector<8x96xf32>
    %c0_20 = arith.constant 0 : index
    %c0_21 = arith.constant 0 : index
    %c0_22 = arith.constant 0 : index
    %42 = vector.load %arg7[%c0_20, %c0_21, %c0_22] : memref<2x1x96xf32, #tpu.memory_space<vmem>>, vector<1x1x96xf32>
    %43 = vector.shape_cast %42 : vector<1x1x96xf32> to vector<1x96xf32>
    %44 = vector.broadcast %43 : vector<1x96xf32> to vector<8x96xf32>
    %45 = arith.addf %41, %44 : vector<8x96xf32>
    %46 = vector.extract_strided_slice %45 {offsets = [0, 0], sizes = [8, 32], strides = [1, 1]} : vector<8x96xf32> to vector<8x32xf32>
    %47 = vector.shape_cast %46 : vector<8x32xf32> to vector<1x8x32xf32>
    %48 = vector.extract_strided_slice %45 {offsets = [0, 32], sizes = [8, 32], strides = [1, 1]} : vector<8x96xf32> to vector<8x32xf32>
    %49 = vector.shape_cast %48 : vector<8x32xf32> to vector<1x8x32xf32>
    %50 = vector.extract_strided_slice %45 {offsets = [0, 64], sizes = [8, 32], strides = [1, 1]} : vector<8x96xf32> to vector<8x32xf32>
    %51 = vector.shape_cast %50 : vector<8x32xf32> to vector<1x8x32xf32>
    %52 = vector.extract_strided_slice %47 {offsets = [0, 0, 0], sizes = [1, 8, 16], strides = [1, 1, 1]} : vector<1x8x32xf32> to vector<1x8x16xf32>
    %53 = vector.extract_strided_slice %49 {offsets = [0, 0, 0], sizes = [1, 8, 16], strides = [1, 1, 1]} : vector<1x8x32xf32> to vector<1x8x16xf32>
    %54 = vector.extract_strided_slice %51 {offsets = [0, 0, 0], sizes = [1, 8, 16], strides = [1, 1, 1]} : vector<1x8x32xf32> to vector<1x8x16xf32>
    %55 = arith.truncf %52 : vector<1x8x16xf32> to vector<1x8x16xbf16>
    %56 = arith.truncf %53 : vector<1x8x16xf32> to vector<1x8x16xbf16>
    "tpu.trace_start"() <{level = 10 : i32, message = "bqd,bkd->bqk"}> : () -> ()
    %cst_23 = arith.constant dense<0.000000e+00> : vector<1x8x8xf32>
    %57 = tpu.matmul %55, %56, %cst_23 {dimension_numbers = #tpu.dot_dimension_numbers<[2], [2], [1], [1], [0, 0, 0, 1, 1, 1], [0], [0]>} : vector<1x8x16xbf16>, vector<1x8x16xbf16>, vector<1x8x8xf32> -> vector<1x8x8xf32>
    "tpu.trace_stop"() : () -> ()
    %58 = arith.addf %57, %11 : vector<1x8x8xf32>
    %cst_24 = arith.constant dense<0xFF800000> : vector<1x8xf32>
    %59 = vector.multi_reduction <maximumf>, %58, %cst_24 [2] : vector<1x8x8xf32> to vector<1x8xf32>
    %60 = vector.shape_cast %59 : vector<1x8xf32> to vector<1x8x1xf32>
    %61 = vector.broadcast %60 : vector<1x8x1xf32> to vector<1x8x8xf32>
    %62 = arith.subf %58, %61 : vector<1x8x8xf32>
    %63 = math.exp %62 : vector<1x8x8xf32>
    %cst_25 = arith.constant dense<0.000000e+00> : vector<1x8xf32>
    %64 = vector.multi_reduction <add>, %63, %cst_25 [2] : vector<1x8x8xf32> to vector<1x8xf32>
    %65 = vector.shape_cast %64 : vector<1x8xf32> to vector<1x8x1xf32>
    %66 = tpu.reciprocal %65 {approx = true} : vector<1x8x1xf32> -> vector<1x8x1xf32>
    %67 = vector.broadcast %66 : vector<1x8x1xf32> to vector<1x8x8xf32>
    %68 = arith.mulf %63, %67 : vector<1x8x8xf32>
    %69 = arith.truncf %68 : vector<1x8x8xf32> to vector<1x8x8xbf16>
    %70 = arith.truncf %54 : vector<1x8x16xf32> to vector<1x8x16xbf16>
    "tpu.trace_start"() <{level = 10 : i32, message = "bqk,bkd->bqd"}> : () -> ()
    %cst_26 = arith.constant dense<0.000000e+00> : vector<1x8x16xf32>
    %71 = tpu.matmul %69, %70, %cst_26 {dimension_numbers = #tpu.dot_dimension_numbers<[2], [1], [1], [2], [0, 0, 0, 1, 1, 2], [0], [0]>} : vector<1x8x8xbf16>, vector<1x8x16xbf16>, vector<1x8x16xf32> -> vector<1x8x16xf32>
    "tpu.trace_stop"() : () -> ()
    %72 = vector.extract_strided_slice %47 {offsets = [0, 0, 16], sizes = [1, 8, 16], strides = [1, 1, 1]} : vector<1x8x32xf32> to vector<1x8x16xf32>
    %73 = vector.extract_strided_slice %49 {offsets = [0, 0, 16], sizes = [1, 8, 16], strides = [1, 1, 1]} : vector<1x8x32xf32> to vector<1x8x16xf32>
    %74 = vector.extract_strided_slice %51 {offsets = [0, 0, 16], sizes = [1, 8, 16], strides = [1, 1, 1]} : vector<1x8x32xf32> to vector<1x8x16xf32>
    %75 = arith.truncf %72 : vector<1x8x16xf32> to vector<1x8x16xbf16>
    %76 = arith.truncf %73 : vector<1x8x16xf32> to vector<1x8x16xbf16>
    "tpu.trace_start"() <{level = 10 : i32, message = "bqd,bkd->bqk"}> : () -> ()
    %cst_27 = arith.constant dense<0.000000e+00> : vector<1x8x8xf32>
    %77 = tpu.matmul %75, %76, %cst_27 {dimension_numbers = #tpu.dot_dimension_numbers<[2], [2], [1], [1], [0, 0, 0, 1, 1, 1], [0], [0]>} : vector<1x8x16xbf16>, vector<1x8x16xbf16>, vector<1x8x8xf32> -> vector<1x8x8xf32>
    "tpu.trace_stop"() : () -> ()
    %78 = arith.addf %77, %11 : vector<1x8x8xf32>
    %cst_28 = arith.constant dense<0xFF800000> : vector<1x8xf32>
    %79 = vector.multi_reduction <maximumf>, %78, %cst_28 [2] : vector<1x8x8xf32> to vector<1x8xf32>
    %80 = vector.shape_cast %79 : vector<1x8xf32> to vector<1x8x1xf32>
    %81 = vector.broadcast %80 : vector<1x8x1xf32> to vector<1x8x8xf32>
    %82 = arith.subf %78, %81 : vector<1x8x8xf32>
    %83 = math.exp %82 : vector<1x8x8xf32>
    %cst_29 = arith.constant dense<0.000000e+00> : vector<1x8xf32>
    %84 = vector.multi_reduction <add>, %83, %cst_29 [2] : vector<1x8x8xf32> to vector<1x8xf32>
    %85 = vector.shape_cast %84 : vector<1x8xf32> to vector<1x8x1xf32>
    %86 = tpu.reciprocal %85 {approx = true} : vector<1x8x1xf32> -> vector<1x8x1xf32>
    %87 = vector.broadcast %86 : vector<1x8x1xf32> to vector<1x8x8xf32>
    %88 = arith.mulf %83, %87 : vector<1x8x8xf32>
    %89 = arith.truncf %88 : vector<1x8x8xf32> to vector<1x8x8xbf16>
    %90 = arith.truncf %74 : vector<1x8x16xf32> to vector<1x8x16xbf16>
    "tpu.trace_start"() <{level = 10 : i32, message = "bqk,bkd->bqd"}> : () -> ()
    %cst_30 = arith.constant dense<0.000000e+00> : vector<1x8x16xf32>
    %91 = tpu.matmul %89, %90, %cst_30 {dimension_numbers = #tpu.dot_dimension_numbers<[2], [1], [1], [2], [0, 0, 0, 1, 1, 2], [0], [0]>} : vector<1x8x8xbf16>, vector<1x8x16xbf16>, vector<1x8x16xf32> -> vector<1x8x16xf32>
    "tpu.trace_stop"() : () -> ()
    %92 = tpu.concatenate %71, %91 in 2 : vector<1x8x16xf32>, vector<1x8x16xf32> -> vector<1x8x32xf32>
    %93 = vector.shape_cast %92 : vector<1x8x32xf32> to vector<8x32xf32>
    %94 = arith.truncf %93 : vector<8x32xf32> to vector<8x32xbf16>
    %c0_31 = arith.constant 0 : index
    %c0_32 = arith.constant 0 : index
    %c0_33 = arith.constant 0 : index
    %95 = vector.load %arg8[%c0_31, %c0_32, %c0_33] : memref<2x32x32xbf16, #tpu.memory_space<vmem>>, vector<1x32x32xbf16>
    %96 = vector.shape_cast %95 : vector<1x32x32xbf16> to vector<32x32xbf16>
    %cst_34 = arith.constant dense<0.000000e+00> : vector<8x32xf32>
    %97 = tpu.matmul %94, %96, %cst_34 {dimension_numbers = #tpu.dot_dimension_numbers<[1], [0], [0], [1], [0, 0, 1, 1], [], []>} : vector<8x32xbf16>, vector<32x32xbf16>, vector<8x32xf32> -> vector<8x32xf32>
    %c0_35 = arith.constant 0 : index
    %c0_36 = arith.constant 0 : index
    %c0_37 = arith.constant 0 : index
    %98 = vector.load %arg9[%c0_35, %c0_36, %c0_37] : memref<2x1x32xf32, #tpu.memory_space<vmem>>, vector<1x1x32xf32>
    %99 = vector.shape_cast %98 : vector<1x1x32xf32> to vector<1x32xf32>
    %100 = vector.broadcast %99 : vector<1x32xf32> to vector<8x32xf32>
    %101 = arith.addf %97, %100 : vector<8x32xf32>
    %102 = arith.addf %4, %101 : vector<8x32xf32>
    %c0_38 = arith.constant 0 : index
    %c0_39 = arith.constant 0 : index
    %c0_40 = arith.constant 0 : index
    %103 = vector.load %arg10[%c0_38, %c0_39, %c0_40] : memref<2x1x32xf32, #tpu.memory_space<vmem>>, vector<1x1x32xf32>
    %104 = vector.shape_cast %103 : vector<1x1x32xf32> to vector<1x32xf32>
    %c0_41 = arith.constant 0 : index
    %c0_42 = arith.constant 0 : index
    %c0_43 = arith.constant 0 : index
    %105 = vector.load %arg11[%c0_41, %c0_42, %c0_43] : memref<2x1x32xf32, #tpu.memory_space<vmem>>, vector<1x1x32xf32>
    %106 = vector.shape_cast %105 : vector<1x1x32xf32> to vector<1x32xf32>
    %cst_44 = arith.constant dense<0.000000e+00> : vector<8xf32>
    %107 = vector.multi_reduction <add>, %102, %cst_44 [1] : vector<8x32xf32> to vector<8xf32>
    %108 = vector.shape_cast %107 : vector<8xf32> to vector<8x1xf32>
    %cst_45 = arith.constant 3.200000e+01 : f32
    %109 = vector.broadcast %cst_45 : f32 to vector<8x1xf32>
    %110 = arith.divf %108, %109 : vector<8x1xf32>
    %111 = vector.broadcast %110 : vector<8x1xf32> to vector<8x32xf32>
    %112 = arith.subf %102, %111 : vector<8x32xf32>
    %113 = arith.mulf %112, %112 : vector<8x32xf32>
    %cst_46 = arith.constant dense<0.000000e+00> : vector<8xf32>
    %114 = vector.multi_reduction <add>, %113, %cst_46 [1] : vector<8x32xf32> to vector<8xf32>
    %115 = vector.shape_cast %114 : vector<8xf32> to vector<8x1xf32>
    %cst_47 = arith.constant 3.200000e+01 : f32
    %116 = vector.broadcast %cst_47 : f32 to vector<8x1xf32>
    %117 = arith.divf %115, %116 : vector<8x1xf32>
    %118 = vector.broadcast %110 : vector<8x1xf32> to vector<8x32xf32>
    %119 = arith.subf %102, %118 : vector<8x32xf32>
    %cst_48 = arith.constant 9.99999974E-6 : f32
    %120 = vector.broadcast %cst_48 : f32 to vector<8x1xf32>
    %121 = arith.addf %117, %120 : vector<8x1xf32>
    %122 = math.rsqrt %121 : vector<8x1xf32>
    %123 = vector.broadcast %122 : vector<8x1xf32> to vector<8x32xf32>
    %124 = arith.mulf %119, %123 : vector<8x32xf32>
    %125 = vector.broadcast %104 : vector<1x32xf32> to vector<8x32xf32>
    %126 = arith.mulf %124, %125 : vector<8x32xf32>
    %127 = vector.broadcast %106 : vector<1x32xf32> to vector<8x32xf32>
    %128 = arith.addf %126, %127 : vector<8x32xf32>
    %129 = arith.truncf %128 : vector<8x32xf32> to vector<8x32xbf16>
    %c0_49 = arith.constant 0 : index
    %c0_50 = arith.constant 0 : index
    %c0_51 = arith.constant 0 : index
    %130 = vector.load %arg12[%c0_49, %c0_50, %c0_51] : memref<2x32x128xbf16, #tpu.memory_space<vmem>>, vector<1x32x128xbf16>
    %131 = vector.shape_cast %130 : vector<1x32x128xbf16> to vector<32x128xbf16>
    %cst_52 = arith.constant dense<0.000000e+00> : vector<8x128xf32>
    %132 = tpu.matmul %129, %131, %cst_52 {dimension_numbers = #tpu.dot_dimension_numbers<[1], [0], [0], [1], [0, 0, 1, 1], [], []>} : vector<8x32xbf16>, vector<32x128xbf16>, vector<8x128xf32> -> vector<8x128xf32>
    %c0_53 = arith.constant 0 : index
    %c0_54 = arith.constant 0 : index
    %c0_55 = arith.constant 0 : index
    %133 = vector.load %arg13[%c0_53, %c0_54, %c0_55] : memref<2x1x128xf32, #tpu.memory_space<vmem>>, vector<1x1x128xf32>
    %134 = vector.shape_cast %133 : vector<1x1x128xf32> to vector<1x128xf32>
    %135 = vector.broadcast %134 : vector<1x128xf32> to vector<8x128xf32>
    %136 = arith.addf %132, %135 : vector<8x128xf32>
    %cst_56 = arith.constant 1.702000e+00 : f32
    %137 = vector.broadcast %cst_56 : f32 to vector<8x128xf32>
    %138 = arith.mulf %137, %136 : vector<8x128xf32>
    %139 = arith.negf %138 : vector<8x128xf32>
    %140 = math.exp %139 : vector<8x128xf32>
    %cst_57 = arith.constant 1.000000e+00 : f32
    %141 = vector.broadcast %cst_57 : f32 to vector<8x128xf32>
    %142 = arith.addf %141, %140 : vector<8x128xf32>
    %143 = arith.divf %141, %142 : vector<8x128xf32>
    %144 = arith.mulf %136, %143 : vector<8x128xf32>
    %145 = arith.truncf %144 : vector<8x128xf32> to vector<8x128xbf16>
    %c0_58 = arith.constant 0 : index
    %c0_59 = arith.constant 0 : index
    %c0_60 = arith.constant 0 : index
    %146 = vector.load %arg14[%c0_58, %c0_59, %c0_60] : memref<2x128x32xbf16, #tpu.memory_space<vmem>>, vector<1x128x32xbf16>
    %147 = vector.shape_cast %146 : vector<1x128x32xbf16> to vector<128x32xbf16>
    %cst_61 = arith.constant dense<0.000000e+00> : vector<8x32xf32>
    %148 = tpu.matmul %145, %147, %cst_61 {dimension_numbers = #tpu.dot_dimension_numbers<[1], [0], [0], [1], [0, 0, 1, 1], [], []>} : vector<8x128xbf16>, vector<128x32xbf16>, vector<8x32xf32> -> vector<8x32xf32>
    %c0_62 = arith.constant 0 : index
    %c0_63 = arith.constant 0 : index
    %c0_64 = arith.constant 0 : index
    %149 = vector.load %arg15[%c0_62, %c0_63, %c0_64] : memref<2x1x32xf32, #tpu.memory_space<vmem>>, vector<1x1x32xf32>
    %150 = vector.shape_cast %149 : vector<1x1x32xf32> to vector<1x32xf32>
    %151 = vector.broadcast %150 : vector<1x32xf32> to vector<8x32xf32>
    %152 = arith.addf %148, %151 : vector<8x32xf32>
    %153 = arith.addf %102, %152 : vector<8x32xf32>
    %c1 = arith.constant 1 : index
    %c0_65 = arith.constant 0 : index
    %c0_66 = arith.constant 0 : index
    %154 = vector.load %arg4[%c1, %c0_65, %c0_66] : memref<2x1x32xf32, #tpu.memory_space<vmem>>, vector<1x1x32xf32>
    %155 = vector.shape_cast %154 : vector<1x1x32xf32> to vector<1x32xf32>
    %c1_67 = arith.constant 1 : index
    %c0_68 = arith.constant 0 : index
    %c0_69 = arith.constant 0 : index
    %156 = vector.load %arg5[%c1_67, %c0_68, %c0_69] : memref<2x1x32xf32, #tpu.memory_space<vmem>>, vector<1x1x32xf32>
    %157 = vector.shape_cast %156 : vector<1x1x32xf32> to vector<1x32xf32>
    %cst_70 = arith.constant dense<0.000000e+00> : vector<8xf32>
    %158 = vector.multi_reduction <add>, %153, %cst_70 [1] : vector<8x32xf32> to vector<8xf32>
    %159 = vector.shape_cast %158 : vector<8xf32> to vector<8x1xf32>
    %cst_71 = arith.constant 3.200000e+01 : f32
    %160 = vector.broadcast %cst_71 : f32 to vector<8x1xf32>
    %161 = arith.divf %159, %160 : vector<8x1xf32>
    %162 = vector.broadcast %161 : vector<8x1xf32> to vector<8x32xf32>
    %163 = arith.subf %153, %162 : vector<8x32xf32>
    %164 = arith.mulf %163, %163 : vector<8x32xf32>
    %cst_72 = arith.constant dense<0.000000e+00> : vector<8xf32>
    %165 = vector.multi_reduction <add>, %164, %cst_72 [1] : vector<8x32xf32> to vector<8xf32>
    %166 = vector.shape_cast %165 : vector<8xf32> to vector<8x1xf32>
    %cst_73 = arith.constant 3.200000e+01 : f32
    %167 = vector.broadcast %cst_73 : f32 to vector<8x1xf32>
    %168 = arith.divf %166, %167 : vector<8x1xf32>
    %169 = vector.broadcast %161 : vector<8x1xf32> to vector<8x32xf32>
    %170 = arith.subf %153, %169 : vector<8x32xf32>
    %cst_74 = arith.constant 9.99999974E-6 : f32
    %171 = vector.broadcast %cst_74 : f32 to vector<8x1xf32>
    %172 = arith.addf %168, %171 : vector<8x1xf32>
    %173 = math.rsqrt %172 : vector<8x1xf32>
    %174 = vector.broadcast %173 : vector<8x1xf32> to vector<8x32xf32>
    %175 = arith.mulf %170, %174 : vector<8x32xf32>
    %176 = vector.broadcast %155 : vector<1x32xf32> to vector<8x32xf32>
    %177 = arith.mulf %175, %176 : vector<8x32xf32>
    %178 = vector.broadcast %157 : vector<1x32xf32> to vector<8x32xf32>
    %179 = arith.addf %177, %178 : vector<8x32xf32>
    %180 = arith.truncf %179 : vector<8x32xf32> to vector<8x32xbf16>
    %c1_75 = arith.constant 1 : index
    %c0_76 = arith.constant 0 : index
    %c0_77 = arith.constant 0 : index
    %181 = vector.load %arg6[%c1_75, %c0_76, %c0_77] : memref<2x32x96xbf16, #tpu.memory_space<vmem>>, vector<1x32x96xbf16>
    %182 = vector.shape_cast %181 : vector<1x32x96xbf16> to vector<32x96xbf16>
    %cst_78 = arith.constant dense<0.000000e+00> : vector<8x96xf32>
    %183 = tpu.matmul %180, %182, %cst_78 {dimension_numbers = #tpu.dot_dimension_numbers<[1], [0], [0], [1], [0, 0, 1, 1], [], []>} : vector<8x32xbf16>, vector<32x96xbf16>, vector<8x96xf32> -> vector<8x96xf32>
    %c1_79 = arith.constant 1 : index
    %c0_80 = arith.constant 0 : index
    %c0_81 = arith.constant 0 : index
    %184 = vector.load %arg7[%c1_79, %c0_80, %c0_81] : memref<2x1x96xf32, #tpu.memory_space<vmem>>, vector<1x1x96xf32>
    %185 = vector.shape_cast %184 : vector<1x1x96xf32> to vector<1x96xf32>
    %186 = vector.broadcast %185 : vector<1x96xf32> to vector<8x96xf32>
    %187 = arith.addf %183, %186 : vector<8x96xf32>
    %188 = vector.extract_strided_slice %187 {offsets = [0, 0], sizes = [8, 32], strides = [1, 1]} : vector<8x96xf32> to vector<8x32xf32>
    %189 = vector.shape_cast %188 : vector<8x32xf32> to vector<1x8x32xf32>
    %190 = vector.extract_strided_slice %187 {offsets = [0, 32], sizes = [8, 32], strides = [1, 1]} : vector<8x96xf32> to vector<8x32xf32>
    %191 = vector.shape_cast %190 : vector<8x32xf32> to vector<1x8x32xf32>
    %192 = vector.extract_strided_slice %187 {offsets = [0, 64], sizes = [8, 32], strides = [1, 1]} : vector<8x96xf32> to vector<8x32xf32>
    %193 = vector.shape_cast %192 : vector<8x32xf32> to vector<1x8x32xf32>
    %194 = vector.extract_strided_slice %189 {offsets = [0, 0, 0], sizes = [1, 8, 16], strides = [1, 1, 1]} : vector<1x8x32xf32> to vector<1x8x16xf32>
    %195 = vector.extract_strided_slice %191 {offsets = [0, 0, 0], sizes = [1, 8, 16], strides = [1, 1, 1]} : vector<1x8x32xf32> to vector<1x8x16xf32>
    %196 = vector.extract_strided_slice %193 {offsets = [0, 0, 0], sizes = [1, 8, 16], strides = [1, 1, 1]} : vector<1x8x32xf32> to vector<1x8x16xf32>
    %197 = arith.truncf %194 : vector<1x8x16xf32> to vector<1x8x16xbf16>
    %198 = arith.truncf %195 : vector<1x8x16xf32> to vector<1x8x16xbf16>
    "tpu.trace_start"() <{level = 10 : i32, message = "bqd,bkd->bqk"}> : () -> ()
    %cst_82 = arith.constant dense<0.000000e+00> : vector<1x8x8xf32>
    %199 = tpu.matmul %197, %198, %cst_82 {dimension_numbers = #tpu.dot_dimension_numbers<[2], [2], [1], [1], [0, 0, 0, 1, 1, 1], [0], [0]>} : vector<1x8x16xbf16>, vector<1x8x16xbf16>, vector<1x8x8xf32> -> vector<1x8x8xf32>
    "tpu.trace_stop"() : () -> ()
    %200 = arith.addf %199, %11 : vector<1x8x8xf32>
    %cst_83 = arith.constant dense<0xFF800000> : vector<1x8xf32>
    %201 = vector.multi_reduction <maximumf>, %200, %cst_83 [2] : vector<1x8x8xf32> to vector<1x8xf32>
    %202 = vector.shape_cast %201 : vector<1x8xf32> to vector<1x8x1xf32>
    %203 = vector.broadcast %202 : vector<1x8x1xf32> to vector<1x8x8xf32>
    %204 = arith.subf %200, %203 : vector<1x8x8xf32>
    %205 = math.exp %204 : vector<1x8x8xf32>
    %cst_84 = arith.constant dense<0.000000e+00> : vector<1x8xf32>
    %206 = vector.multi_reduction <add>, %205, %cst_84 [2] : vector<1x8x8xf32> to vector<1x8xf32>
    %207 = vector.shape_cast %206 : vector<1x8xf32> to vector<1x8x1xf32>
    %208 = tpu.reciprocal %207 {approx = true} : vector<1x8x1xf32> -> vector<1x8x1xf32>
    %209 = vector.broadcast %208 : vector<1x8x1xf32> to vector<1x8x8xf32>
    %210 = arith.mulf %205, %209 : vector<1x8x8xf32>
    %211 = arith.truncf %210 : vector<1x8x8xf32> to vector<1x8x8xbf16>
    %212 = arith.truncf %196 : vector<1x8x16xf32> to vector<1x8x16xbf16>
    "tpu.trace_start"() <{level = 10 : i32, message = "bqk,bkd->bqd"}> : () -> ()
    %cst_85 = arith.constant dense<0.000000e+00> : vector<1x8x16xf32>
    %213 = tpu.matmul %211, %212, %cst_85 {dimension_numbers = #tpu.dot_dimension_numbers<[2], [1], [1], [2], [0, 0, 0, 1, 1, 2], [0], [0]>} : vector<1x8x8xbf16>, vector<1x8x16xbf16>, vector<1x8x16xf32> -> vector<1x8x16xf32>
    "tpu.trace_stop"() : () -> ()
    %214 = vector.extract_strided_slice %189 {offsets = [0, 0, 16], sizes = [1, 8, 16], strides = [1, 1, 1]} : vector<1x8x32xf32> to vector<1x8x16xf32>
    %215 = vector.extract_strided_slice %191 {offsets = [0, 0, 16], sizes = [1, 8, 16], strides = [1, 1, 1]} : vector<1x8x32xf32> to vector<1x8x16xf32>
    %216 = vector.extract_strided_slice %193 {offsets = [0, 0, 16], sizes = [1, 8, 16], strides = [1, 1, 1]} : vector<1x8x32xf32> to vector<1x8x16xf32>
    %217 = arith.truncf %214 : vector<1x8x16xf32> to vector<1x8x16xbf16>
    %218 = arith.truncf %215 : vector<1x8x16xf32> to vector<1x8x16xbf16>
    "tpu.trace_start"() <{level = 10 : i32, message = "bqd,bkd->bqk"}> : () -> ()
    %cst_86 = arith.constant dense<0.000000e+00> : vector<1x8x8xf32>
    %219 = tpu.matmul %217, %218, %cst_86 {dimension_numbers = #tpu.dot_dimension_numbers<[2], [2], [1], [1], [0, 0, 0, 1, 1, 1], [0], [0]>} : vector<1x8x16xbf16>, vector<1x8x16xbf16>, vector<1x8x8xf32> -> vector<1x8x8xf32>
    "tpu.trace_stop"() : () -> ()
    %220 = arith.addf %219, %11 : vector<1x8x8xf32>
    %cst_87 = arith.constant dense<0xFF800000> : vector<1x8xf32>
    %221 = vector.multi_reduction <maximumf>, %220, %cst_87 [2] : vector<1x8x8xf32> to vector<1x8xf32>
    %222 = vector.shape_cast %221 : vector<1x8xf32> to vector<1x8x1xf32>
    %223 = vector.broadcast %222 : vector<1x8x1xf32> to vector<1x8x8xf32>
    %224 = arith.subf %220, %223 : vector<1x8x8xf32>
    %225 = math.exp %224 : vector<1x8x8xf32>
    %cst_88 = arith.constant dense<0.000000e+00> : vector<1x8xf32>
    %226 = vector.multi_reduction <add>, %225, %cst_88 [2] : vector<1x8x8xf32> to vector<1x8xf32>
    %227 = vector.shape_cast %226 : vector<1x8xf32> to vector<1x8x1xf32>
    %228 = tpu.reciprocal %227 {approx = true} : vector<1x8x1xf32> -> vector<1x8x1xf32>
    %229 = vector.broadcast %228 : vector<1x8x1xf32> to vector<1x8x8xf32>
    %230 = arith.mulf %225, %229 : vector<1x8x8xf32>
    %231 = arith.truncf %230 : vector<1x8x8xf32> to vector<1x8x8xbf16>
    %232 = arith.truncf %216 : vector<1x8x16xf32> to vector<1x8x16xbf16>
    "tpu.trace_start"() <{level = 10 : i32, message = "bqk,bkd->bqd"}> : () -> ()
    %cst_89 = arith.constant dense<0.000000e+00> : vector<1x8x16xf32>
    %233 = tpu.matmul %231, %232, %cst_89 {dimension_numbers = #tpu.dot_dimension_numbers<[2], [1], [1], [2], [0, 0, 0, 1, 1, 2], [0], [0]>} : vector<1x8x8xbf16>, vector<1x8x16xbf16>, vector<1x8x16xf32> -> vector<1x8x16xf32>
    "tpu.trace_stop"() : () -> ()
    %234 = tpu.concatenate %213, %233 in 2 : vector<1x8x16xf32>, vector<1x8x16xf32> -> vector<1x8x32xf32>
    %235 = vector.shape_cast %234 : vector<1x8x32xf32> to vector<8x32xf32>
    %236 = arith.truncf %235 : vector<8x32xf32> to vector<8x32xbf16>
    %c1_90 = arith.constant 1 : index
    %c0_91 = arith.constant 0 : index
    %c0_92 = arith.constant 0 : index
    %237 = vector.load %arg8[%c1_90, %c0_91, %c0_92] : memref<2x32x32xbf16, #tpu.memory_space<vmem>>, vector<1x32x32xbf16>
    %238 = vector.shape_cast %237 : vector<1x32x32xbf16> to vector<32x32xbf16>
    %cst_93 = arith.constant dense<0.000000e+00> : vector<8x32xf32>
    %239 = tpu.matmul %236, %238, %cst_93 {dimension_numbers = #tpu.dot_dimension_numbers<[1], [0], [0], [1], [0, 0, 1, 1], [], []>} : vector<8x32xbf16>, vector<32x32xbf16>, vector<8x32xf32> -> vector<8x32xf32>
    %c1_94 = arith.constant 1 : index
    %c0_95 = arith.constant 0 : index
    %c0_96 = arith.constant 0 : index
    %240 = vector.load %arg9[%c1_94, %c0_95, %c0_96] : memref<2x1x32xf32, #tpu.memory_space<vmem>>, vector<1x1x32xf32>
    %241 = vector.shape_cast %240 : vector<1x1x32xf32> to vector<1x32xf32>
    %242 = vector.broadcast %241 : vector<1x32xf32> to vector<8x32xf32>
    %243 = arith.addf %239, %242 : vector<8x32xf32>
    %244 = arith.addf %153, %243 : vector<8x32xf32>
    %c1_97 = arith.constant 1 : index
    %c0_98 = arith.constant 0 : index
    %c0_99 = arith.constant 0 : index
    %245 = vector.load %arg10[%c1_97, %c0_98, %c0_99] : memref<2x1x32xf32, #tpu.memory_space<vmem>>, vector<1x1x32xf32>
    %246 = vector.shape_cast %245 : vector<1x1x32xf32> to vector<1x32xf32>
    %c1_100 = arith.constant 1 : index
    %c0_101 = arith.constant 0 : index
    %c0_102 = arith.constant 0 : index
    %247 = vector.load %arg11[%c1_100, %c0_101, %c0_102] : memref<2x1x32xf32, #tpu.memory_space<vmem>>, vector<1x1x32xf32>
    %248 = vector.shape_cast %247 : vector<1x1x32xf32> to vector<1x32xf32>
    %cst_103 = arith.constant dense<0.000000e+00> : vector<8xf32>
    %249 = vector.multi_reduction <add>, %244, %cst_103 [1] : vector<8x32xf32> to vector<8xf32>
    %250 = vector.shape_cast %249 : vector<8xf32> to vector<8x1xf32>
    %cst_104 = arith.constant 3.200000e+01 : f32
    %251 = vector.broadcast %cst_104 : f32 to vector<8x1xf32>
    %252 = arith.divf %250, %251 : vector<8x1xf32>
    %253 = vector.broadcast %252 : vector<8x1xf32> to vector<8x32xf32>
    %254 = arith.subf %244, %253 : vector<8x32xf32>
    %255 = arith.mulf %254, %254 : vector<8x32xf32>
    %cst_105 = arith.constant dense<0.000000e+00> : vector<8xf32>
    %256 = vector.multi_reduction <add>, %255, %cst_105 [1] : vector<8x32xf32> to vector<8xf32>
    %257 = vector.shape_cast %256 : vector<8xf32> to vector<8x1xf32>
    %cst_106 = arith.constant 3.200000e+01 : f32
    %258 = vector.broadcast %cst_106 : f32 to vector<8x1xf32>
    %259 = arith.divf %257, %258 : vector<8x1xf32>
    %260 = vector.broadcast %252 : vector<8x1xf32> to vector<8x32xf32>
    %261 = arith.subf %244, %260 : vector<8x32xf32>
    %cst_107 = arith.constant 9.99999974E-6 : f32
    %262 = vector.broadcast %cst_107 : f32 to vector<8x1xf32>
    %263 = arith.addf %259, %262 : vector<8x1xf32>
    %264 = math.rsqrt %263 : vector<8x1xf32>
    %265 = vector.broadcast %264 : vector<8x1xf32> to vector<8x32xf32>
    %266 = arith.mulf %261, %265 : vector<8x32xf32>
    %267 = vector.broadcast %246 : vector<1x32xf32> to vector<8x32xf32>
    %268 = arith.mulf %266, %267 : vector<8x32xf32>
    %269 = vector.broadcast %248 : vector<1x32xf32> to vector<8x32xf32>
    %270 = arith.addf %268, %269 : vector<8x32xf32>
    %271 = arith.truncf %270 : vector<8x32xf32> to vector<8x32xbf16>
    %c1_108 = arith.constant 1 : index
    %c0_109 = arith.constant 0 : index
    %c0_110 = arith.constant 0 : index
    %272 = vector.load %arg12[%c1_108, %c0_109, %c0_110] : memref<2x32x128xbf16, #tpu.memory_space<vmem>>, vector<1x32x128xbf16>
    %273 = vector.shape_cast %272 : vector<1x32x128xbf16> to vector<32x128xbf16>
    %cst_111 = arith.constant dense<0.000000e+00> : vector<8x128xf32>
    %274 = tpu.matmul %271, %273, %cst_111 {dimension_numbers = #tpu.dot_dimension_numbers<[1], [0], [0], [1], [0, 0, 1, 1], [], []>} : vector<8x32xbf16>, vector<32x128xbf16>, vector<8x128xf32> -> vector<8x128xf32>
    %c1_112 = arith.constant 1 : index
    %c0_113 = arith.constant 0 : index
    %c0_114 = arith.constant 0 : index
    %275 = vector.load %arg13[%c1_112, %c0_113, %c0_114] : memref<2x1x128xf32, #tpu.memory_space<vmem>>, vector<1x1x128xf32>
    %276 = vector.shape_cast %275 : vector<1x1x128xf32> to vector<1x128xf32>
    %277 = vector.broadcast %276 : vector<1x128xf32> to vector<8x128xf32>
    %278 = arith.addf %274, %277 : vector<8x128xf32>
    %cst_115 = arith.constant 1.702000e+00 : f32
    %279 = vector.broadcast %cst_115 : f32 to vector<8x128xf32>
    %280 = arith.mulf %279, %278 : vector<8x128xf32>
    %281 = arith.negf %280 : vector<8x128xf32>
    %282 = math.exp %281 : vector<8x128xf32>
    %cst_116 = arith.constant 1.000000e+00 : f32
    %283 = vector.broadcast %cst_116 : f32 to vector<8x128xf32>
    %284 = arith.addf %283, %282 : vector<8x128xf32>
    %285 = arith.divf %283, %284 : vector<8x128xf32>
    %286 = arith.mulf %278, %285 : vector<8x128xf32>
    %287 = arith.truncf %286 : vector<8x128xf32> to vector<8x128xbf16>
    %c1_117 = arith.constant 1 : index
    %c0_118 = arith.constant 0 : index
    %c0_119 = arith.constant 0 : index
    %288 = vector.load %arg14[%c1_117, %c0_118, %c0_119] : memref<2x128x32xbf16, #tpu.memory_space<vmem>>, vector<1x128x32xbf16>
    %289 = vector.shape_cast %288 : vector<1x128x32xbf16> to vector<128x32xbf16>
    %cst_120 = arith.constant dense<0.000000e+00> : vector<8x32xf32>
    %290 = tpu.matmul %287, %289, %cst_120 {dimension_numbers = #tpu.dot_dimension_numbers<[1], [0], [0], [1], [0, 0, 1, 1], [], []>} : vector<8x128xbf16>, vector<128x32xbf16>, vector<8x32xf32> -> vector<8x32xf32>
    %c1_121 = arith.constant 1 : index
    %c0_122 = arith.constant 0 : index
    %c0_123 = arith.constant 0 : index
    %291 = vector.load %arg15[%c1_121, %c0_122, %c0_123] : memref<2x1x32xf32, #tpu.memory_space<vmem>>, vector<1x1x32xf32>
    %292 = vector.shape_cast %291 : vector<1x1x32xf32> to vector<1x32xf32>
    %293 = vector.broadcast %292 : vector<1x32xf32> to vector<8x32xf32>
    %294 = arith.addf %290, %293 : vector<8x32xf32>
    %295 = arith.addf %244, %294 : vector<8x32xf32>
    %296 = arith.index_cast %arg0 : i32 to index
    %c0_124 = arith.constant 0 : index
    %297 = memref.load %arg2[%296, %c0_124] : memref<2x8xi32, #tpu.memory_space<smem>>
    %298 = arith.index_cast %arg0 : i32 to index
    %c1_125 = arith.constant 1 : index
    %299 = memref.load %arg2[%298, %c1_125] : memref<2x8xi32, #tpu.memory_space<smem>>
    %300 = arith.cmpi sgt, %299, %297 : i32
    %301 = arith.select %300, %299, %297 : i32
    %c1_i32 = arith.constant 1 : i32
    %c0_i32 = arith.constant 0 : i32
    %302 = arith.select %300, %c1_i32, %c0_i32 : i32
    %303 = arith.index_cast %arg0 : i32 to index
    %c2 = arith.constant 2 : index
    %304 = memref.load %arg2[%303, %c2] : memref<2x8xi32, #tpu.memory_space<smem>>
    %305 = arith.cmpi sgt, %304, %301 : i32
    %306 = arith.select %305, %304, %301 : i32
    %c2_i32 = arith.constant 2 : i32
    %307 = arith.select %305, %c2_i32, %302 : i32
    %308 = arith.index_cast %arg0 : i32 to index
    %c3 = arith.constant 3 : index
    %309 = memref.load %arg2[%308, %c3] : memref<2x8xi32, #tpu.memory_space<smem>>
    %310 = arith.cmpi sgt, %309, %306 : i32
    %311 = arith.select %310, %309, %306 : i32
    %c3_i32 = arith.constant 3 : i32
    %312 = arith.select %310, %c3_i32, %307 : i32
    %313 = arith.index_cast %arg0 : i32 to index
    %c4 = arith.constant 4 : index
    %314 = memref.load %arg2[%313, %c4] : memref<2x8xi32, #tpu.memory_space<smem>>
    %315 = arith.cmpi sgt, %314, %311 : i32
    %316 = arith.select %315, %314, %311 : i32
    %c4_i32 = arith.constant 4 : i32
    %317 = arith.select %315, %c4_i32, %312 : i32
    %318 = arith.index_cast %arg0 : i32 to index
    %c5 = arith.constant 5 : index
    %319 = memref.load %arg2[%318, %c5] : memref<2x8xi32, #tpu.memory_space<smem>>
    %320 = arith.cmpi sgt, %319, %316 : i32
    %321 = arith.select %320, %319, %316 : i32
    %c5_i32 = arith.constant 5 : i32
    %322 = arith.select %320, %c5_i32, %317 : i32
    %323 = arith.index_cast %arg0 : i32 to index
    %c6 = arith.constant 6 : index
    %324 = memref.load %arg2[%323, %c6] : memref<2x8xi32, #tpu.memory_space<smem>>
    %325 = arith.cmpi sgt, %324, %321 : i32
    %326 = arith.select %325, %324, %321 : i32
    %c6_i32 = arith.constant 6 : i32
    %327 = arith.select %325, %c6_i32, %322 : i32
    %328 = arith.index_cast %arg0 : i32 to index
    %c7 = arith.constant 7 : index
    %329 = memref.load %arg2[%328, %c7] : memref<2x8xi32, #tpu.memory_space<smem>>
    %330 = arith.cmpi sgt, %329, %326 : i32
    %c7_i32 = arith.constant 7 : i32
    %331 = arith.select %330, %c7_i32, %327 : i32
    %332 = tpu.iota {dimensions = array<i32: 1>} : vector<1x8xi32>
    %333 = vector.broadcast %331 : i32 to vector<1x8xi32>
    %334 = arith.cmpi eq, %332, %333 : vector<1x8xi32>
    %335 = arith.extui %334 : vector<1x8xi1> to vector<1x8xi32>
    %336 = arith.sitofp %335 : vector<1x8xi32> to vector<1x8xf32>
    %cst_126 = arith.constant dense<0.000000e+00> : vector<1x32xf32>
    %337 = tpu.matmul %336, %295, %cst_126 {dimension_numbers = #tpu.dot_dimension_numbers<[1], [0], [0], [1], [0, 0, 1, 1], [], []>} : vector<1x8xf32>, vector<8x32xf32>, vector<1x32xf32> -> vector<1x32xf32>
    %c0_127 = arith.constant 0 : index
    %c0_128 = arith.constant 0 : index
    %338 = vector.load %arg16[%c0_127, %c0_128] : memref<1x32xf32, #tpu.memory_space<vmem>>, vector<1x32xf32>
    %c0_129 = arith.constant 0 : index
    %c0_130 = arith.constant 0 : index
    %339 = vector.load %arg17[%c0_129, %c0_130] : memref<1x32xf32, #tpu.memory_space<vmem>>, vector<1x32xf32>
    %cst_131 = arith.constant dense<0.000000e+00> : vector<1xf32>
    %340 = vector.multi_reduction <add>, %337, %cst_131 [1] : vector<1x32xf32> to vector<1xf32>
    %341 = vector.shape_cast %340 : vector<1xf32> to vector<1x1xf32>
    %cst_132 = arith.constant 3.200000e+01 : f32
    %342 = vector.broadcast %cst_132 : f32 to vector<1x1xf32>
    %343 = arith.divf %341, %342 : vector<1x1xf32>
    %344 = vector.broadcast %343 : vector<1x1xf32> to vector<1x32xf32>
    %345 = arith.subf %337, %344 : vector<1x32xf32>
    %346 = arith.mulf %345, %345 : vector<1x32xf32>
    %cst_133 = arith.constant dense<0.000000e+00> : vector<1xf32>
    %347 = vector.multi_reduction <add>, %346, %cst_133 [1] : vector<1x32xf32> to vector<1xf32>
    %348 = vector.shape_cast %347 : vector<1xf32> to vector<1x1xf32>
    %cst_134 = arith.constant 3.200000e+01 : f32
    %349 = vector.broadcast %cst_134 : f32 to vector<1x1xf32>
    %350 = arith.divf %348, %349 : vector<1x1xf32>
    %351 = vector.broadcast %343 : vector<1x1xf32> to vector<1x32xf32>
    %352 = arith.subf %337, %351 : vector<1x32xf32>
    %cst_135 = arith.constant 9.99999974E-6 : f32
    %353 = vector.broadcast %cst_135 : f32 to vector<1x1xf32>
    %354 = arith.addf %350, %353 : vector<1x1xf32>
    %355 = math.rsqrt %354 : vector<1x1xf32>
    %356 = vector.broadcast %355 : vector<1x1xf32> to vector<1x32xf32>
    %357 = arith.mulf %352, %356 : vector<1x32xf32>
    %358 = arith.mulf %357, %338 : vector<1x32xf32>
    %359 = arith.addf %358, %339 : vector<1x32xf32>
    %360 = arith.truncf %359 : vector<1x32xf32> to vector<1x32xbf16>
    %c0_136 = arith.constant 0 : index
    %c0_137 = arith.constant 0 : index
    %361 = vector.load %arg18[%c0_136, %c0_137] : memref<32x128xbf16, #tpu.memory_space<vmem>>, vector<32x128xbf16>
    %cst_138 = arith.constant dense<0.000000e+00> : vector<1x128xf32>
    %362 = tpu.matmul %360, %361, %cst_138 {dimension_numbers = #tpu.dot_dimension_numbers<[1], [0], [0], [1], [0, 0, 1, 1], [], []>} : vector<1x32xbf16>, vector<32x128xbf16>, vector<1x128xf32> -> vector<1x128xf32>
    %363 = vector.shape_cast %362 : vector<1x128xf32> to vector<1x1x128xf32>
    %c0_139 = arith.constant 0 : index
    %c0_140 = arith.constant 0 : index
    %c0_141 = arith.constant 0 : index
    %364 = vector.load %arg19[%c0_139, %c0_140, %c0_141] : memref<1x1x128xf32, #tpu.memory_space<vmem>>, vector<1x1x128xf32>
    tpu.vector_store %arg19[%c0_139, %c0_140, %c0_141], %363 {strides = array<i32>} : memref<1x1x128xf32, #tpu.memory_space<vmem>>, vector<1x1x128xf32>,
    return
  }
  func.func @transform_0(%arg0: i32) -> (i32, i32, i32) {
    %c0_i32 = arith.constant 0 : i32
    %c0_i32_0 = arith.constant 0 : i32
    %c0_i32_1 = arith.constant 0 : i32
    return %arg0, %c0_i32, %c0_i32_0 : i32, i32, i32
  }
  func.func @transform_1(%arg0: i32) -> (i32, i32) {
    %c0_i32 = arith.constant 0 : i32
    %c0_i32_0 = arith.constant 0 : i32
    %c0_i32_1 = arith.constant 0 : i32
    return %c0_i32, %c0_i32_0 : i32, i32
  }
  func.func @transform_2(%arg0: i32) -> (i32, i32) {
    %c0_i32 = arith.constant 0 : i32
    %c0_i32_0 = arith.constant 0 : i32
    %c0_i32_1 = arith.constant 0 : i32
    return %c0_i32, %c0_i32_0 : i32, i32
  }
  func.func @transform_3(%arg0: i32) -> (i32, i32, i32) {
    %c0_i32 = arith.constant 0 : i32
    %c0_i32_0 = arith.constant 0 : i32
    %c0_i32_1 = arith.constant 0 : i32
    %c0_i32_2 = arith.constant 0 : i32
    return %c0_i32, %c0_i32_0, %c0_i32_1 : i32, i32, i32
  }
  func.func @transform_4(%arg0: i32) -> (i32, i32, i32) {
    %c0_i32 = arith.constant 0 : i32
    %c0_i32_0 = arith.constant 0 : i32
    %c0_i32_1 = arith.constant 0 : i32
    %c0_i32_2 = arith.constant 0 : i32
    return %c0_i32, %c0_i32_0, %c0_i32_1 : i32, i32, i32
  }
  func.func @transform_5(%arg0: i32) -> (i32, i32, i32) {
    %c0_i32 = arith.constant 0 : i32
    %c0_i32_0 = arith.constant 0 : i32
    %c0_i32_1 = arith.constant 0 : i32
    %c0_i32_2 = arith.constant 0 : i32
    return %c0_i32, %c0_i32_0, %c0_i32_1 : i32, i32, i32
  }
  func.func @transform_6(%arg0: i32) -> (i32, i32, i32) {
    %c0_i32 = arith.constant 0 : i32
    %c0_i32_0 = arith.constant 0 : i32
    %c0_i32_1 = arith.constant 0 : i32
    %c0_i32_2 = arith.constant 0 : i32
    return %c0_i32, %c0_i32_0, %c0_i32_1 : i32, i32, i32
  }
  func.func @transform_7(%arg0: i32) -> (i32, i32, i32) {
    %c0_i32 = arith.constant 0 : i32
    %c0_i32_0 = arith.constant 0 : i32
    %c0_i32_1 = arith.constant 0 : i32
    %c0_i32_2 = arith.constant 0 : i32
    return %c0_i32, %c0_i32_0, %c0_i32_1 : i32, i32, i32
  }
  func.func @transform_8(%arg0: i32) -> (i32, i32, i32) {
    %c0_i32 = arith.constant 0 : i32
    %c0_i32_0 = arith.constant 0 : i32
    %c0_i32_1 = arith.constant 0 : i32
    %c0_i32_2 = arith.constant 0 : i32
    return %c0_i32, %c0_i32_0, %c0_i32_1 : i32, i32, i32
  }
  func.func @transform_9(%arg0: i32) -> (i32, i32, i32) {
    %c0_i32 = arith.constant 0 : i32
    %c0_i32_0 = arith.constant 0 : i32
    %c0_i32_1 = arith.constant 0 : i32
    %c0_i32_2 = arith.constant 0 : i32
    return %c0_i32, %c0_i32_0, %c0_i32_1 : i32, i32, i32
  }
  func.func @transform_10(%arg0: i32) -> (i32, i32, i32) {
    %c0_i32 = arith.constant 0 : i32
    %c0_i32_0 = arith.constant 0 : i32
    %c0_i32_1 = arith.constant 0 : i32
    %c0_i32_2 = arith.constant 0 : i32
    return %c0_i32, %c0_i32_0, %c0_i32_1 : i32, i32, i32
  }
  func.func @transform_11(%arg0: i32) -> (i32, i32, i32) {
    %c0_i32 = arith.constant 0 : i32
    %c0_i32_0 = arith.constant 0 : i32
    %c0_i32_1 = arith.constant 0 : i32
    %c0_i32_2 = arith.constant 0 : i32
    return %c0_i32, %c0_i32_0, %c0_i32_1 : i32, i32, i32
  }
  func.func @transform_12(%arg0: i32) -> (i32, i32, i32) {
    %c0_i32 = arith.constant 0 : i32
    %c0_i32_0 = arith.constant 0 : i32
    %c0_i32_1 = arith.constant 0 : i32
    %c0_i32_2 = arith.constant 0 : i32
    return %c0_i32, %c0_i32_0, %c0_i32_1 : i32, i32, i32
  }
  func.func @transform_13(%arg0: i32) -> (i32, i32, i32) {
    %c0_i32 = arith.constant 0 : i32
    %c0_i32_0 = arith.constant 0 : i32
    %c0_i32_1 = arith.constant 0 : i32
    %c0_i32_2 = arith.constant 0 : i32
    return %c0_i32, %c0_i32_0, %c0_i32_1 : i32, i32, i32
  }
  func.func @transform_14(%arg0: i32) -> (i32, i32, i32) {
    %c0_i32 = arith.constant 0 : i32
    %c0_i32_0 = arith.constant 0 : i32
    %c0_i32_1 = arith.constant 0 : i32
    %c0_i32_2 = arith.constant 0 : i32
    return %c0_i32, %c0_i32_0, %c0_i32_1 : i32, i32, i32
  }
  func.func @transform_15(%arg0: i32) -> (i32, i32) {
    %c0_i32 = arith.constant 0 : i32
    %c0_i32_0 = arith.constant 0 : i32
    %c0_i32_1 = arith.constant 0 : i32
    return %c0_i32, %c0_i32_0 : i32, i32
  }
  func.func @transform_16(%arg0: i32) -> (i32, i32) {
    %c0_i32 = arith.constant 0 : i32
    %c0_i32_0 = arith.constant 0 : i32
    %c0_i32_1 = arith.constant 0 : i32
    return %c0_i32, %c0_i32_0 : i32, i32
  }
  func.func @transform_17(%arg0: i32) -> (i32, i32) {
    %c0_i32 = arith.constant 0 : i32
    %c0_i32_0 = arith.constant 0 : i32
    %c0_i32_1 = arith.constant 0 : i32
    return %c0_i32, %c0_i32_0 : i32, i32
  }
  func.func @transform_18(%arg0: i32) -> (i32, i32, i32) {
    %c0_i32 = arith.constant 0 : i32
    %c0_i32_0 = arith.constant 0 : i32
    %c0_i32_1 = arith.constant 0 : i32
    return %arg0, %c0_i32, %c0_i32_0 : i32, i32, i32
  }
}

</mosaic_0001>

<bundles_post_ra>
// kernel: tpu_custom_call.1
= control target key start
LH: loop header
LB: loop body
LE: loop exit
PB: predicated region body
PF: predicated region fallthrough
CT: control target
= control target key end

     0   :  { %s2478_s0 = inlined_call_operand.vmem [shape: f32[2,8,32], index: 0, kind: input, shape index: {}]   ;;  %s2479_s1 = inlined_call_operand.vmem [shape: s32[2,8], index: 1, kind: input, shape index: {}]   ;;  %s2480_s2 = inlined_call_operand.vmem [shape: f32[8,32], index: 2, kind: input, shape index: {}]   ;;  %s2481_s3 = inlined_call_operand.vmem [shape: f32[2,1,32], index: 3, kind: input, shape index: {}]   ;;  %s2482_s4 = inlined_call_operand.vmem [shape: f32[2,1,32], index: 4, kind: input, shape index: {}]   ;;  %s2483_s5 = inlined_call_operand.vmem [shape: bf16[2,32,96], index: 5, kind: input, shape index: {}]   ;;  %s2484_s6 = inlined_call_operand.vmem [shape: f32[2,1,96], index: 6, kind: input, shape index: {}]   ;;  %s2485_s7 = inlined_call_operand.vmem [shape: bf16[2,32,32], index: 7, kind: input, shape index: {}]   ;;  %s2486_s8 = inlined_call_operand.vmem [shape: f32[2,1,32], index: 8, kind: input, shape index: {}]   ;;  %s2487_s9 = inlined_call_operand.vmem [shape: f32[2,1,32], index: 9, kind: input, shape index: {}]   ;;  %s2488_s10 = inlined_call_operand.vmem [shape: f32[2,1,32], index: 10, kind: input, shape index: {}]   ;;  %s2489_s11 = inlined_call_operand.vmem [shape: bf16[2,32,128], index: 11, kind: input, shape index: {}]   ;;  %s2490_s12 = inlined_call_operand.vmem [shape: f32[2,1,128], index: 12, kind: input, shape index: {}]   ;;  %s2491_s13 = inlined_call_operand.vmem [shape: bf16[2,128,32], index: 13, kind: input, shape index: {}]   ;;  %s2492_s14 = inlined_call_operand.vmem [shape: f32[2,1,32], index: 14, kind: input, shape index: {}]   ;;  %s2493_s15 = inlined_call_operand.vmem [shape: f32[1,32], index: 15, kind: input, shape index: {}]   ;;  %s2494_s16 = inlined_call_operand.vmem [shape: f32[1,32], index: 16, kind: input, shape index: {}]   ;;  %s2495_s17 = inlined_call_operand.vmem [shape: bf16[32,128], index: 17, kind: input, shape index: {}]   ;;  %s2496_s18 = inlined_call_operand.hbm [shape: f32[2,1,128], index: 18, kind: output, shape index: {}]  }
   0x1   :  { %2507 = sst [smem:[#allocation13_spill]] %s2478_s0 }
   0x2   :  { %2508 = sst [smem:[#allocation14_spill]] %s2479_s1 }
   0x3   :  { %2509 = sst [smem:[#allocation15_spill]] %s2480_s2 }
   0x4   :  { %2510 = sst [smem:[#allocation16_spill]] %s2481_s3 }
   0x5   :  { %2511 = sst [smem:[#allocation17_spill]] %s2482_s4 }
   0x6   :  { %2512 = sst [smem:[#allocation18_spill]] %s2483_s5 }
   0x7   :  { %2513 = sst [smem:[#allocation19_spill]] %s2484_s6 }
   0x8   :  { %23 = vsyncpa [#allocation4], 0 }
   0x9   :  { %24 = vsyncpa [#allocation3], 0 }
   0xa   :  { %26 = vsyncpa [#allocation3 + $0x1], 0  ;;  %s2133_s27 = smov 0   ;;  %s2135_s28 = smov 0  }
   0xb   :  { %s2137_s29 = smov 0   ;;  %s2139_s30 = smov 0  }
   0xc LB: > { %2514 = sst [smem:[#allocation8_spill]] %s2014_s27  ;;  %s2154_s0 = sadd.s32 4294967295, %s2026_s30   ;;  %s2026_s30 = sphi %s2139_s30, %s2535_s30   ;;  %s2022_s29 = sphi %s2137_s29, %s2537_s29   ;;  %s2018_s28 = sphi %s2135_s28, %s2539_s28   ;;  %s2014_s27 = sphi %s2133_s27, %s2538_s27  }
   0xd   : > { %2515 = sst [smem:[#allocation9_spill]] %s2022_s29  ;;  %s1619_s19 = sadd.s32 4294967294, %s2026_s30  }
   0xe   : > { %s2158_s1 = sadd.s32 1, %s2026_s30   ;;  %s422_s20 = sadd.s32 1, %s2022_s29 }
   0xf   : > { %2516 = sst [smem:[#allocation10_spill]] %s2158_s1  ;;  %s419_s21 = ssub.s32 %s2026_s30, %s2158_s1 }
  0x10   : > { %p432_p0 = scmp.ne.s32.totalorder %s2022_s29, %s2018_s28  ;;  %p420_p1 = scmp.eq.s32.totalorder %s419_s21, 0 }
  0x11   : > { %p433_p2 = scmp.eq.s32.totalorder %s2154_s0, 1  ;;  %p438_p3 = scmp.ne.s32.totalorder %s2018_s28, %s2014_s27 }
  0x12   : > { %p439_p4 = scmp.eq.s32.totalorder %s1619_s19, 1  ;;  %p1620_p7 = scmp.ge.s32.totalorder %s2026_s30, 1 }
  0x13   : > { %s2169_s22 = scalar_select %p420_p1, %s2022_s29, %s422_s20  }
  0x14   : > { %p2171_p5 = por %p433_p2, %p432_p0  ;;  %p2175_p6 = por %p439_p4, %p438_p3 }
  0x15   : > { %2517 = sst [smem:[#allocation11_spill]] %s2169_s22  ;;  %p446_p8 = scmp.lt.s32.totalorder %s2026_s30, 3 }
  0x16   : > { %s2519_s23 = scalar_select %p2175_p6, 1, 0 }
  0x17   : > { %p1848_p9 = scmp.eq.s32.totalorder %s2154_s0, 0  ;;  %p447_p10 = pnand %p1620_p7, %p446_p8 }
  0x18   : > { %2520 = sst [smem:[#allocation12_spill]] %s2519_s23  ;;  %s2028_s19 = smov [#allocation2]  }
  0x19   : > { %s2521_s26 = sld [smem:[#allocation14_spill]]  ;;  %p1840_p11 = pneg %p447_p10 }
  0x1b   : > { %p1841_p12 = pnand %p1848_p9, %p1840_p11 }
  0x1c   : > { %526 = sbr.rel (%p447_p10) target bundleno = 4700 (0x125c), region = 92 }
  0x1f   : > { %s458_s21 = sshll.u32 %s2521_s26, 4  ;;  %s459_s21 = int_to_ptr.vmem [resolvable:$true] %s458_s21 }
  0x20   : > { %1843 = dma.vmem_to_smem (!%p1841_p12), %s459_s21, 32, %s2028_s19, [#allocation4]  }
  0x21   : > { %2005 = dma.done.wait (%p1848_p9), [#allocation4], 32  }
  0x22   : > { %2007 = vsyncadd (%p1848_p9), [#allocation4], 4294967264 }
  0x23   : > { %533 = sfence }
  0x24   : > { %p580_p13 = scmp.lt.s32.totalorder %s2154_s0, 1  ;;  %s2522_s23 = sld [smem:[#allocation15_spill]]  ;;  %vm596_vm0 = vcmask 261120   ;;  %v2029_v4 = vmov 32.0   ;;  %vm715_vm5 = vcmask 1043456   ;;  %vm677_vm6 = vcmask 130048  }
  0x25   : > { %s2523_s26 = sld [smem:[#allocation13_spill]]  ;;  %1909 = vrcp.f32 %v2029_v4  ;;  %s2505_s29 = smov 96   ;;  %v588_v47 = vlaneseq  ;;  %v2033_v50 = vmov -1e+09   ;;  %vm697_vm8 = vcmask 64512  }
  0x26   : > { %s581_s20 = scalar_select %p580_p13, %s2154_s0, 1 }
  0x27   : > { %s2524_s5 = sld [smem:[#allocation18_spill]]  ;;  %v589_v48 = vshrl.u32 %v588_v47, 7  ;;  %v2226_v49 = vand.u32 127, %v588_v47  ;;  %s2504_s1 = smov 48  }
  0x28   : > { %s1625_s22 = sshll.u32 %s581_s20, 3  ;;  %s2525_s3 = sld [smem:[#allocation16_spill]] }
  0x29   : > { %s2526_s4 = sld [smem:[#allocation17_spill]]  ;;  %vm592_vm7 = vcmp.le.s32.totalorder %v2226_v49, %v589_v48  ;;  %s2502_s19 = smov 16  }
  0x2a   : > { %v586_v0 = vld [vmem:[%s2522_s23] sm:$0xff]  ;;  %s2527_s6 = sld [smem:[#allocation19_spill]]  ;;  %v2229_v51 = vsel %vm592_vm7, 0.0, %v2033_v50  ;;  %s2529_s25 = smov 96  }
  0x2b   : > { %s583_s27 = scalar_lea.vmem %s2523_s26, %s1625_s22  ;;  %v1910_v5 = vpop.eup %1909  ;;  %s2506_s26 = smov 80   ;;  %v1897_v50 = vld [vmem:[%s2487_s9] ss:$0 sm:$0xff] }
  0x2c   : > { %v585_v1 = vld [vmem:[%s583_s27] sm:$0xff]  ;;  %v601_v6 = vmul.f32 32.0, %v1910_v5  ;;  %vm605_vm1 = vweird.f32 %v1910_v5  ;;  %s2503_s27 = smov 64   ;;  %s2035_s22 = smov 112  }
  0x2d   : > { %v2193_v2 = vadd.f32 %v586_v0, %v585_v1  ;;  %v1805_v16 = vld [vmem:[%s2524_s5 + $0x8] sm:$0xff]  ;;  %v1804_v17 = vld [vmem:[%s2524_s5] sm:$0xff]  ;;  %s2532_s21 = smov 16  }
  0x2e   : > { %v602_v7 = vsub.f32 1.0, %v601_v6  ;;  %664 = vmatpush.bf16.msra.mxu0 %v1805_v16  ;;  %v1893_v27 = vld [vmem:[%s2525_s3] ss:$0 sm:$0xff] }
  0x2f   : > { %v597_v3 = vsel %vm596_vm0, %v2193_v2, 0.0  ;;  %v1894_v30 = vld [vmem:[%s2526_s4] ss:$0 sm:$0xff] }
  0x30   : > { %598 = vadd.xlane.f32.xlu0 %v597_v3  ;;  %v603_v8 = vmul.f32 %v1910_v5, %v602_v7  ;;  %v1895_v34 = vld [vmem:[%s2527_s6] ss:$0 sm:$0xff] }
  0x32   : > { %v604_v9 = vadd.f32 %v1910_v5, %v603_v8  ;;  %665 = vmatpush.bf16.msra.mxu0 %v1804_v17 }
  0x34   : > { %v2197_v10 = vsel %vm605_vm1, %v1910_v5, %v604_v9 }
  0xa3   : > { %v599_v11 = vpop.xlane.xlu0 %598 }
  0xa4   : > { %v607_v12 = vmul.f32 %v2197_v10, %v599_v11 }
  0xa6   : > { %v608_v13 = vsub.f32 %v2193_v2, %v607_v12 }
  0xa8   : > { %v609_v14 = vmul.f32 %v608_v13, %v608_v13 }
  0xaa   : > { %v610_v15 = vsel %vm596_vm0, %v609_v14, 0.0 }
  0xab   : > { %611 = vadd.xlane.f32.xlu0 %v610_v15 }
 0x11e   : > { %v612_v18 = vpop.xlane.xlu0 %611 }
 0x11f   : > { %v613_v19 = vmul.f32 %v612_v18, %v2197_v10 }
 0x121   : > { %v614_v20 = vadd.f32 1e-05, %v613_v19 }
 0x123   : > { %1911 = vrsqrt.f32 %v614_v20  ;;  %vm621_vm3 = vweird.f32 %v614_v20 }
 0x129   : > { %v1912_v21 = vpop.eup %1911 }
 0x12a   : > { %v616_v22 = vmul.f32 %v1912_v21, %v614_v20  ;;  %vm622_vm2 = vweird.f32 %v1912_v21 }
 0x12b   : > { %vm623_vm4 = vmor %vm621_vm3, %vm622_vm2 }
 0x12c   : > { %v617_v23 = vmul.f32 %v1912_v21, %v616_v22 }
 0x12e   : > { %v618_v24 = vmul.f32 0.5, %v617_v23 }
 0x130   : > { %v619_v25 = vsub.f32 1.5, %v618_v24  ;;  %v1806_v24 = vld [vmem:[%s2485_s7] sm:$0xff] }
 0x132   : > { %v620_v26 = vmul.f32 %v1912_v21, %v619_v25 }
 0x134   : > { %v624_v28 = vsel %vm623_vm4, %v1912_v21, %v620_v26  ;;  %v1807_v21 = vld [vmem:[%s2485_s7 + $0x8] sm:$0xff] }
 0x135   : > { %v625_v29 = vmul.f32 %v624_v28, %v608_v13  ;;  %823 = vmatpush.bf16.msrb.mxu0 %v1807_v21  ;;  %v1896_v28 = vld [vmem:[%s2486_s8] ss:$0 sm:$0xff] }
 0x137   : > { %v629_v31 = vmul.f32 %v1893_v27, %v625_v29 }
 0x139   : > { %v633_v32 = vadd.f32 %v1894_v30, %v629_v31  ;;  %824 = vmatpush.bf16.msrb.mxu0 %v1806_v24  ;;  %v1900_v24 = vld [vmem:[%s2492_s14] ss:$0 sm:$0xff] }
 0x13b   : > { %v634_v33 = vpack.c.bf16 %v633_v32, %v633_v32 }
 0x13d   : > { %1634 = vmatmul.msk.bf16.vlgmr.msra.gmra.mxu0 %vm596_vm0, %v634_v33 }
 0x1ba   : > { %v667_v35 = vpop.f32.mrf.mxu0 }
 0x1bb   : > { %v668_v36 = vadd.f32 %v1895_v34, %v667_v35 }
 0x1bd   : > { %v671_v37 = vpack.c.bf16 %v668_v36, %v668_v36 }
 0x1bf   : > { %v673_v38 = vunpack.c.l.b16 %v671_v37 }
 0x1c1   : > { %v674_v39 = vpack.c.b16 %v673_v38, %v673_v38 }
 0x1c2   : > { %v669_v40 = vpop.f32.mrf.mxu0 }
 0x1c3   : > { %734 = vrot.lane.b32.xlu0 %v674_v39, %s2506_s26  ;;  %710 = vrot.lane.b32.xlu2 %v674_v39, %s2503_s27  ;;  %s2531_s27 = smov 64  }
 0x1c4   : > { %675 = vrot.lane.b32.xlu1 %v674_v39, %s2505_s29 }
 0x21d   : > { %v711_v41 = vpop.permute.xlu2 %710 }
 0x21e   : > { %v717_v42 = vsel %vm715_vm5, %v711_v41, 0 }
 0x21f   : > { %726 = vmatpush.bf16.msra.mxu3 %v717_v42 }
 0x235   : > { %v735_v43 = vpop.permute.xlu0 %734 }
 0x236   : > { %v676_v44 = vpop.permute.xlu1 %675  ;;  %v740_v45 = vsel %vm677_vm6, %v735_v43, 0 }
 0x237   : > { %v682_v46 = vsel %vm677_vm6, %v676_v44, 0  ;;  %749 = vmatpush.bf16.xpose.msrb.mxu3 %v740_v45 }
 0x238   : > { %691 = vmatpush.bf16.xpose.msra.mxu1 %v682_v46 }
 0x23f   : > { %1635 = vmatmul.msk.bf16.vlgmr.msra.gmra.mxu1 %vm677_vm6, %v671_v37 }
 0x2bc   : > { %v693_v52 = vpop.f32.mrf.mxu1 }
 0x2bd   : > { %v694_v53 = vadd.f32 %v693_v52, %v2229_v51 }
 0x2bf   : > { %v698_v54 = vsel %vm697_vm8, %v694_v53, -inf }
 0x2c0   : > { %699 = vmax.xlane.f32.xlu1 %v698_v54  ;;  %v1898_v54 = vld [vmem:[%s2488_s10] ss:$0 sm:$0xff] }
 0x2c4   : > { %v695_v55 = vpop.f32.mrf.mxu1 }
 0x2d9   : > { %767 = vrot.lane.b32.xlu1 %v674_v39, %s2504_s1  ;;  %s2413_s1 = sshll.u32 %s2154_s0, 7 }
 0x2da   : > { %s1417_s23 = sadd.s32 1, %s2413_s1  ;;  %s1422_s24 = sadd.s32 2, %s2413_s1 }
 0x2db   : > { %s1418_s20 = sld [smem:[#allocation2 + %s1417_s23]] }
 0x2dc   : > { %s1423_s26 = sld [smem:[#allocation2 + %s1422_s24]] }
 0x333   : > { %v700_v56 = vpop.xlane.xlu1 %699 }
 0x334   : > { %v701_v57 = vsub.f32 %v694_v53, %v700_v56 }
 0x336   : > { %v702_v58 = vmul.f32 1.442695, %v701_v57 }
 0x338   : > { %1913 = vpow2.f32 %v702_v58  ;;  %v1817_v58 = vld [vmem:[%s2491_s13 + $0x38] sm:$0xff] }
 0x33e   : > { %v1914_v59 = vpop.eup %1913 }
 0x33f   : > { %v704_v60 = vsel %vm697_vm8, %v1914_v59, 0.0 }
 0x340   : > { %705 = vadd.xlane.f32.xlu2 %v704_v60  ;;  %v1815_v60 = vld [vmem:[%s2491_s13 + $0x28] sm:$0xff] }
 0x34b   : > { %v768_v61 = vpop.permute.xlu1 %767 }
 0x34c   : > { %v773_v62 = vsel %vm715_vm5, %v768_v61, 0  ;;  %v1814_v61 = vld [vmem:[%s2491_s13 + $0x20] sm:$0xff] }
 0x34d   : > { %782 = vmatpush.bf16.msra.mxu2 %v773_v62  ;;  %v1813_v62 = vld [vmem:[%s2491_s13 + $0x18] sm:$0xff] }
 0x358   : > { %732 = vrot.lane.b32.xlu2 %v674_v39, %s2035_s22  ;;  %v1809_v39 = vld [vmem:[%s2489_s11 + $0x8] sm:$0xff] }
 0x359   : > { %893 = vmatpush.bf16.msrb.mxu1 %v1809_v39 }
 0x3b3   : > { %v706_v63 = vpop.xlane.xlu2 %705 }
 0x3b4   : > { %1915 = vrcp.f32 %v706_v63  ;;  %v1812_v63 = vld [vmem:[%s2491_s13 + $0x10] sm:$0xff] }
 0x3ba   : > { %v1916_v0 = vpop.eup %1915 }
 0x3bb   : > { %v708_v1 = vmul.f32 %v1916_v0, %v1914_v59  ;;  %v733_v4 = vpop.permute.xlu2 %732  ;;  %v1816_v59 = vld [vmem:[%s2491_s13 + $0x30] sm:$0xff]  ;;  %v1811_v0 = vld [vmem:[%s2491_s13 + $0x8] sm:$0xff] }
 0x3bd   : > { %v709_v3 = vpack.c.bf16 %v708_v1, %v708_v1  ;;  %v1899_v1 = vld [vmem:[%s2490_s12] ss:$0 sm:$0xff] }
 0x3bf   : > { %1636 = vmatmul.msk.bf16.vlgmr.msra.gmra.mxu3 %vm697_vm8, %v709_v3 }
 0x3c0   : > { %990 = vmatpush.bf16.msra.mxu3 %v1817_v58 }
 0x3c4   : > { %991 = vmatpush.bf16.msra.mxu3 %v1816_v59 }
 0x3c8   : > { %992 = vmatpush.bf16.msra.mxu3 %v1815_v60 }
 0x3cc   : > { %993 = vmatpush.bf16.msra.mxu3 %v1814_v61 }
 0x3cf   : > { %1637 = vmatmul.msk.bf16.vlgmr.msrb.gmra.mxu3 %vm677_vm6, %v733_v4  ;;  %v1810_v4 = vld [vmem:[%s2491_s13] sm:$0xff] }
 0x3d0   : > { %994 = vmatpush.bf16.msra.mxu3 %v1813_v62 }
 0x3d4   : > { %995 = vmatpush.bf16.msra.mxu3 %v1812_v63 }
 0x3d8   : > { %996 = vmatpush.bf16.msra.mxu3 %v1811_v0 }
 0x3dc   : > { %997 = vmatpush.bf16.msra.mxu3 %v1810_v4 }
 0x442   : > { %v728_v5 = vpop.f32.mrf.mxu3 }
 0x44a   : > { %v730_v6 = vpop.f32.mrf.mxu3 }
 0x452   : > { %v751_v7 = vpop.f32.mrf.mxu3 }
 0x453   : > { %v752_v8 = vadd.f32 %v751_v7, %v2229_v51 }
 0x455   : > { %v755_v9 = vsel %vm697_vm8, %v752_v8, -inf }
 0x456   : > { %756 = vmax.xlane.f32.xlu0 %v755_v9 }
 0x45a   : > { %v753_v11 = vpop.f32.mrf.mxu3 }
 0x4c9   : > { %v757_v12 = vpop.xlane.xlu0 %756 }
 0x4ca   : > { %v758_v13 = vsub.f32 %v752_v8, %v757_v12 }
 0x4cc   : > { %v759_v14 = vmul.f32 1.442695, %v758_v13 }
 0x4ce   : > { %1917 = vpow2.f32 %v759_v14 }
 0x4d4   : > { %v1918_v15 = vpop.eup %1917 }
 0x4d5   : > { %v761_v16 = vsel %vm697_vm8, %v1918_v15, 0.0 }
 0x4d6   : > { %762 = vadd.xlane.f32.xlu2 %v761_v16 }
 0x549   : > { %v763_v17 = vpop.xlane.xlu2 %762 }
 0x54a   : > { %1919 = vrcp.f32 %v763_v17 }
 0x550   : > { %v1920_v18 = vpop.eup %1919 }
 0x551   : > { %v765_v19 = vmul.f32 %v1920_v18, %v1918_v15 }
 0x553   : > { %v766_v20 = vpack.c.bf16 %v765_v19, %v765_v19 }
 0x555   : > { %1638 = vmatmul.msk.bf16.vlgmr.msra.gmra.mxu2 %vm697_vm8, %v766_v20 }
 0x5d8   : > { %v784_v22 = vpop.f32.mrf.mxu2 }
 0x5d9   : > { %789 = vrot.lane.b32.xlu1 %v784_v22, %s2502_s19  ;;  %s2528_s19 = smov 80  }
 0x5e0   : > { %v786_v23 = vpop.f32.mrf.mxu2 }
 0x64b   : > { %v790_v25 = vpop.permute.xlu1 %789 }
 0x64c   : > { %v792_v26 = vsel %vm677_vm6, %v728_v5, %v790_v25 }
 0x64d   : > { %v793_v27 = vpack.c.bf16 %v792_v26, %v792_v26 }
 0x64f   : > { %1647 = vmatmul.msk.bf16.vlgmr.msrb.gmra.mxu0 %vm596_vm0, %v793_v27 }
 0x6cc   : > { %v826_v29 = vpop.f32.mrf.mxu0 }
 0x6cd   : > { %v827_v30 = vadd.f32 %v1896_v28, %v826_v29 }
 0x6cf   : > { %v2256_v31 = vadd.f32 %v827_v30, %v2193_v2  ;;  %v1808_v2 = vld [vmem:[%s2489_s11] sm:$0xff] }
 0x6d0   : > { %894 = vmatpush.bf16.msrb.mxu1 %v1808_v2 }
 0x6d1   : > { %v833_v32 = vsel %vm596_vm0, %v2256_v31, 0.0 }
 0x6d2   : > { %834 = vadd.xlane.f32.xlu0 %v833_v32 }
 0x6d4   : > { %v828_v33 = vpop.f32.mrf.mxu0 }
 0x745   : > { %v835_v34 = vpop.xlane.xlu0 %834 }
 0x746   : > { %v836_v35 = vmul.f32 %v835_v34, %v2197_v10 }
 0x748   : > { %v837_v36 = vsub.f32 %v2256_v31, %v836_v35 }
 0x74a   : > { %v838_v37 = vmul.f32 %v837_v36, %v837_v36 }
 0x74c   : > { %v839_v38 = vsel %vm596_vm0, %v838_v37, 0.0 }
 0x74d   : > { %840 = vadd.xlane.f32.xlu2 %v839_v38 }
 0x7c0   : > { %v841_v40 = vpop.xlane.xlu2 %840 }
 0x7c1   : > { %v842_v41 = vmul.f32 %v841_v40, %v2197_v10 }
 0x7c3   : > { %v843_v42 = vadd.f32 1e-05, %v842_v41 }
 0x7c5   : > { %1921 = vrsqrt.f32 %v843_v42  ;;  %vm850_vm10 = vweird.f32 %v843_v42 }
 0x7cb   : > { %v1922_v43 = vpop.eup %1921 }
 0x7cc   : > { %v845_v44 = vmul.f32 %v1922_v43, %v843_v42  ;;  %vm851_vm9 = vweird.f32 %v1922_v43 }
 0x7cd   : > { %vm852_vm11 = vmor %vm850_vm10, %vm851_vm9 }
 0x7ce   : > { %v846_v45 = vmul.f32 %v1922_v43, %v845_v44 }
 0x7d0   : > { %v847_v46 = vmul.f32 0.5, %v846_v45  ;;  %v1901_v45 = vld [vmem:[%s2525_s3 + $0x1] ss:$0 sm:$0xff]  ;;  %s1437_s3 = sadd.s32 5, %s2413_s1 }
 0x7d2   : > { %v848_v47 = vsub.f32 1.5, %v847_v46 }
 0x7d4   : > { %v849_v48 = vmul.f32 %v1922_v43, %v848_v47 }
 0x7d6   : > { %v853_v52 = vsel %vm852_vm11, %v1922_v43, %v849_v48  ;;  %v1902_v48 = vld [vmem:[%s2526_s4 + $0x1] ss:$0 sm:$0xff]  ;;  %s1438_s4 = sld [smem:[#allocation2 + %s1437_s3]] }
 0x7d7   : > { %v854_v53 = vmul.f32 %v853_v52, %v837_v36  ;;  %v1819_v36 = vld [vmem:[%s2524_s5 + $0x18] sm:$0xff] }
 0x7d8   : > { %1070 = vmatpush.bf16.msrb.mxu2 %v1819_v36 }
 0x7d9   : > { %v858_v55 = vmul.f32 %v1897_v50, %v854_v53 }
 0x7db   : > { %v862_v56 = vadd.f32 %v1898_v54, %v858_v55  ;;  %v1903_v54 = vld [vmem:[%s2527_s6 + $0x1] ss:$0 sm:$0xff]  ;;  %s1447_s6 = sadd.s32 7, %s2413_s1 }
 0x7dd   : > { %v863_v57 = vpack.c.bf16 %v862_v56, %v862_v56 }
 0x7df   : > { %1656 = vmatmul.msk.bf16.vlgmr.msrb.gmra.mxu1 %vm596_vm0, %v863_v57 }
 0x85c   : > { %v896_v3 = vpop.f32.mrf.mxu1 }
 0x85d   : > { %v897_v5 = vadd.f32 %v1899_v1, %v896_v3 }
 0x85f   : > { %v1657_v6 = vmul.f32 -1.702, %v897_v5 }
 0x861   : > { %v902_v7 = vmul.f32 1.442695, %v1657_v6 }
 0x863   : > { %1923 = vpow2.f32 %v902_v7 }
 0x864   : > { %v898_v8 = vpop.f32.mrf.mxu1 }
 0x869   : > { %v1924_v9 = vpop.eup %1923 }
 0x86a   : > { %v904_v11 = vadd.f32 1.0, %v1924_v9 }
 0x86c   : > { %1925 = vrcp.f32 %v904_v11  ;;  %v916_v15 = vand.u32 2147483648, %v904_v11  ;;  %v914_v17 = vand.u32 2147483647, %v904_v11  ;;  %vm910_vm13 = vweird.f32 %v904_v11 }
 0x86e   : > { %v917_v19 = vor.u32 1.1754944e-38, %v916_v15  ;;  %vm915_vm15 = vcmp.eq.f32.partialorder %v914_v17, 8.507059e+37 }
 0x872   : > { %v1926_v12 = vpop.eup %1925 }
 0x873   : > { %v906_v13 = vmul.f32 %v1926_v12, %v904_v11  ;;  %vm911_vm12 = vweird.f32 %v1926_v12 }
 0x874   : > { %vm912_vm14 = vmor %vm910_vm13, %vm911_vm12  ;;  %vm1480_vm13 = vcmask 253952  }
 0x875   : > { %v907_v14 = vsub.f32 1.0, %v906_v13 }
 0x877   : > { %v908_v16 = vmul.f32 %v1926_v12, %v907_v14 }
 0x879   : > { %v909_v18 = vadd.f32 %v1926_v12, %v908_v16 }
 0x87b   : > { %v913_v20 = vsel %vm912_vm14, %v1926_v12, %v909_v18 }
 0x87c   : > { %v918_v21 = vsel %vm915_vm15, %v917_v19, %v913_v20 }
 0x87d   : > { %v920_v22 = vmul.f32 %v918_v21, %v897_v5 }
 0x87f   : > { %v921_v23 = vpack.c.bf16 %v920_v22, %v920_v22 }
 0x881   : > { %998 = vmatmul.bf16.vlgmr.msra.gmra.mxu3 %v921_v23 }
 0x904   : > { %v999_v25 = vpop.f32.mrf.mxu3 }
 0x905   : > { %v1000_v26 = vadd.f32 %v1900_v24, %v999_v25 }
 0x907   : > { %v2308_v27 = vadd.f32 %v1000_v26, %v2256_v31  ;;  %v1818_v31 = vld [vmem:[%s2524_s5 + $0x10] sm:$0xff]  ;;  %s1442_s5 = sadd.s32 6, %s2413_s1 }
 0x908   : > { %1071 = vmatpush.bf16.msrb.mxu2 %v1818_v31  ;;  %s1443_s24 = sld [smem:[#allocation2 + %s1442_s5]] }
 0x909   : > { %v1008_v28 = vsel %vm596_vm0, %v2308_v27, 0.0 }
 0x90a   : > { %1009 = vadd.xlane.f32.xlu1 %v1008_v28 }
 0x90c   : > { %v1001_v29 = vpop.f32.mrf.mxu3 }
 0x97d   : > { %v1010_v30 = vpop.xlane.xlu1 %1009 }
 0x97e   : > { %v1011_v32 = vmul.f32 %v1010_v30, %v2197_v10 }
 0x980   : > { %v1012_v33 = vsub.f32 %v2308_v27, %v1011_v32 }
 0x982   : > { %v1013_v34 = vmul.f32 %v1012_v33, %v1012_v33 }
 0x984   : > { %v1014_v35 = vsel %vm596_vm0, %v1013_v34, 0.0 }
 0x985   : > { %1015 = vadd.xlane.f32.xlu0 %v1014_v35  ;;  %v1821_v35 = vld [vmem:[%s2485_s7 + $0x18] sm:$0xff] }
 0x9f8   : > { %v1016_v37 = vpop.xlane.xlu0 %1015 }
 0x9f9   : > { %v1017_v38 = vmul.f32 %v1016_v37, %v2197_v10 }
 0x9fb   : > { %v1018_v39 = vadd.f32 1e-05, %v1017_v38 }
 0x9fd   : > { %1927 = vrsqrt.f32 %v1018_v39  ;;  %vm1025_vm2 = vweird.f32 %v1018_v39 }
 0xa03   : > { %v1928_v2 = vpop.eup %1927 }
 0xa04   : > { %v1020_v40 = vmul.f32 %v1928_v2, %v1018_v39  ;;  %vm1026_vm1 = vweird.f32 %v1928_v2  ;;  %v1820_v39 = vld [vmem:[%s2485_s7 + $0x10] sm:$0xff] }
 0xa05   : > { %vm1027_vm3 = vmor %vm1025_vm2, %vm1026_vm1 }
 0xa06   : > { %v1021_v41 = vmul.f32 %v1928_v2, %v1020_v40 }
 0xa08   : > { %v1022_v42 = vmul.f32 0.5, %v1021_v41 }
 0xa0a   : > { %v1023_v43 = vsub.f32 1.5, %v1022_v42  ;;  %v1904_v42 = vld [vmem:[%s2486_s8 + $0x1] ss:$0 sm:$0xff] }
 0xa0c   : > { %v1024_v44 = vmul.f32 %v1928_v2, %v1023_v43 }
 0xa0e   : > { %v1028_v46 = vsel %vm1027_vm3, %v1928_v2, %v1024_v44 }
 0xa0f   : > { %v1029_v47 = vmul.f32 %v1028_v46, %v1012_v33 }
 0xa11   : > { %v1033_v50 = vmul.f32 %v1901_v45, %v1029_v47 }
 0xa13   : > { %v1037_v52 = vadd.f32 %v1902_v48, %v1033_v50 }
 0xa15   : > { %v1038_v53 = vpack.c.bf16 %v1037_v52, %v1037_v52 }
 0xa17   : > { %1705 = vmatmul.msk.bf16.vlgmr.msrb.gmra.mxu2 %vm596_vm0, %v1038_v53 }
 0xa9a   : > { %v1073_v55 = vpop.f32.mrf.mxu2 }
 0xa9b   : > { %v1074_v56 = vadd.f32 %v1903_v54, %v1073_v55  ;;  %v1823_v55 = vld [vmem:[%s2489_s11 + $0x18] sm:$0xff] }
 0xa9c   : > { %1302 = vmatpush.bf16.msrb.mxu3 %v1823_v55 }
 0xa9d   : > { %v1077_v57 = vpack.c.bf16 %v1074_v56, %v1074_v56 }
 0xa9f   : > { %v1079_v58 = vunpack.c.l.b16 %v1077_v57 }
 0xaa1   : > { %v1080_v59 = vpack.c.b16 %v1079_v58, %v1079_v58 }
 0xaa2   : > { %v1075_v60 = vpop.f32.mrf.mxu2 }
 0xaa3   : > { %1135 = vrot.lane.b32.xlu0 %v1080_v59, %s2035_s22  ;;  %1137 = vrot.lane.b32.xlu2 %v1080_v59, %s2528_s19  ;;  %s2530_s22 = smov 48   ;;  %s1427_s19 = sadd.s32 3, %s2413_s1 }
 0xaab   : > { %1081 = vrot.lane.b32.xlu2 %v1080_v59, %s2529_s25  ;;  %s1428_s25 = sld [smem:[#allocation2 + %s1427_s19]] }
 0xafd   : > { %v1138_v61 = vpop.permute.xlu2 %1137 }
 0xafe   : > { %v1143_v62 = vsel %vm677_vm6, %v1138_v61, 0 }
 0xaff   : > { %1152 = vmatpush.bf16.xpose.msra.mxu2 %v1143_v62 }
 0xb05   : > { %v1082_v63 = vpop.permute.xlu2 %1081 }
 0xb06   : > { %v1087_v0 = vsel %vm677_vm6, %v1082_v63, 0 }
 0xb07   : > { %1096 = vmatpush.bf16.xpose.msra.mxu0 %v1087_v0 }
 0xb0e   : > { %1706 = vmatmul.msk.bf16.vlgmr.msra.gmra.mxu0 %vm677_vm6, %v1077_v57 }
 0xb15   : > { %v1136_v1 = vpop.permute.xlu0 %1135 }
 0xb16   : > { %1708 = vmatmul.msk.bf16.vlgmr.msra.gmra.mxu2 %vm677_vm6, %v1136_v1  ;;  %v1905_v1 = vld [vmem:[%s2487_s9 + $0x1] ss:$0 sm:$0xff] }
 0xb8b   : > { %v1098_v3 = vpop.f32.mrf.mxu0 }
 0xb8c   : > { %v1099_v4 = vadd.f32 %v1098_v3, %v2229_v51 }
 0xb8e   : > { %v1102_v5 = vsel %vm697_vm8, %v1099_v4, -inf }
 0xb8f   : > { %1103 = vmax.xlane.f32.xlu2 %v1102_v5  ;;  %v1906_v5 = vld [vmem:[%s2488_s10 + $0x1] ss:$0 sm:$0xff] }
 0xb93   : > { %v1100_v6 = vpop.f32.mrf.mxu0 }
 0xb99   : > { %v1154_v7 = vpop.f32.mrf.mxu2 }
 0xb9a   : > { %v1155_v8 = vadd.f32 %v1154_v7, %v2229_v51 }
 0xb9c   : > { %v1158_v9 = vsel %vm697_vm8, %v1155_v8, -inf }
 0xb9d   : > { %1159 = vmax.xlane.f32.xlu0 %v1158_v9  ;;  %v1831_v9 = vld [vmem:[%s2491_s13 + $0x78] sm:$0xff] }
 0xb9e   : > { %1401 = vmatpush.bf16.msrb.mxu2 %v1831_v9 }
 0xba1   : > { %v1156_v11 = vpop.f32.mrf.mxu2 }
 0xba2   : > { %v1830_v11 = vld [vmem:[%s2491_s13 + $0x70] sm:$0xff] }
 0xba3   : > { %1402 = vmatpush.bf16.msrb.mxu2 %v1830_v11 }
 0xc02   : > { %v1104_v12 = vpop.xlane.xlu2 %1103 }
 0xc03   : > { %v1105_v13 = vsub.f32 %v1099_v4, %v1104_v12  ;;  %v1829_v12 = vld [vmem:[%s2491_s13 + $0x68] sm:$0xff] }
 0xc04   : > { %1403 = vmatpush.bf16.msrb.mxu2 %v1829_v12 }
 0xc05   : > { %v1106_v14 = vmul.f32 1.442695, %v1105_v13  ;;  %v1828_v13 = vld [vmem:[%s2491_s13 + $0x60] sm:$0xff] }
 0xc07   : > { %1929 = vpow2.f32 %v1106_v14  ;;  %v1827_v14 = vld [vmem:[%s2491_s13 + $0x58] sm:$0xff] }
 0xc08   : > { %1404 = vmatpush.bf16.msrb.mxu2 %v1828_v13 }
 0xc0c   : > { %1405 = vmatpush.bf16.msrb.mxu2 %v1827_v14 }
 0xc0d   : > { %v1930_v15 = vpop.eup %1929 }
 0xc0e   : > { %v1108_v16 = vsel %vm697_vm8, %v1930_v15, 0.0 }
 0xc0f   : > { %1109 = vadd.xlane.f32.xlu0 %v1108_v16  ;;  %v1825_v16 = vld [vmem:[%s2491_s13 + $0x48] sm:$0xff] }
 0xc10   : > { %v1160_v17 = vpop.xlane.xlu0 %1159 }
 0xc11   : > { %v1161_v18 = vsub.f32 %v1155_v8, %v1160_v17  ;;  %v1907_v17 = vld [vmem:[%s2490_s12 + $0x1] ss:$0 sm:$0xff] }
 0xc13   : > { %v1162_v19 = vmul.f32 1.442695, %v1161_v18 }
 0xc15   : > { %1931 = vpow2.f32 %v1162_v19  ;;  %v1824_v19 = vld [vmem:[%s2491_s13 + $0x40] sm:$0xff] }
 0xc1b   : > { %v1932_v20 = vpop.eup %1931 }
 0xc1c   : > { %v1164_v21 = vsel %vm697_vm8, %v1932_v20, 0.0 }
 0xc1d   : > { %1165 = vadd.xlane.f32.xlu1 %v1164_v21 }
 0xc36   : > { %1170 = vrot.lane.b32.xlu1 %v1080_v59, %s2530_s22  ;;  %s1432_s22 = sadd.s32 4, %s2413_s1 }
 0xc3e   : > { %1114 = vrot.lane.b32.xlu1 %v1080_v59, %s2531_s27  ;;  %s1433_s27 = sld [smem:[#allocation2 + %s1432_s22]]  ;;  %s578_s22 = sand.u32 1, %s2018_s28  }
 0xc82   : > { %v1110_v22 = vpop.xlane.xlu0 %1109 }
 0xc90   : > { %v1166_v51 = vpop.xlane.xlu1 %1165 }
 0xc91   : > { %1933 = vrcp.f32 %v1166_v51 }
 0xc92   : > { %1935 = vrcp.f32 %v1110_v22 }
 0xc97   : > { %v1934_v23 = vpop.eup %1933 }
 0xc98   : > { %v1168_v24 = vmul.f32 %v1934_v23, %v1932_v20  ;;  %v1936_v29 = vpop.eup %1935 }
 0xc99   : > { %v1112_v30 = vmul.f32 %v1936_v29, %v1930_v15  ;;  %v1826_v15 = vld [vmem:[%s2491_s13 + $0x50] sm:$0xff] }
 0xc9a   : > { %v1169_v28 = vpack.c.bf16 %v1168_v24, %v1168_v24  ;;  %1406 = vmatpush.bf16.msrb.mxu2 %v1826_v15 }
 0xc9b   : > { %v1113_v34 = vpack.c.bf16 %v1112_v30, %v1112_v30 }
 0xc9e   : > { %1407 = vmatpush.bf16.msrb.mxu2 %v1825_v16 }
 0xca2   : > { %1408 = vmatpush.bf16.msrb.mxu2 %v1824_v19 }
 0xca8   : > { %v1171_v25 = vpop.permute.xlu1 %1170 }
 0xca9   : > { %v1176_v26 = vsel %vm715_vm5, %v1171_v25, 0 }
 0xcaa   : > { %1185 = vmatpush.bf16.msrb.mxu0 %v1176_v26 }
 0xcad   : > { %1709 = vmatmul.msk.bf16.vlgmr.msrb.gmra.mxu0 %vm697_vm8, %v1169_v28 }
 0xcb0   : > { %v1115_v32 = vpop.permute.xlu1 %1114 }
 0xcb1   : > { %v1120_v33 = vsel %vm715_vm5, %v1115_v32, 0 }
 0xcb2   : > { %1129 = vmatpush.bf16.msra.mxu1 %v1120_v33 }
 0xcb5   : > { %1707 = vmatmul.msk.bf16.vlgmr.msra.gmra.mxu1 %vm697_vm8, %v1113_v34 }
 0xcb6   : > { %1228 = vmatpush.bf16.msrb.mxu1 %v1821_v35 }
 0xcba   : > { %1229 = vmatpush.bf16.msrb.mxu1 %v1820_v39 }
 0xd2a   : > { %v1187_v36 = vpop.f32.mrf.mxu0 }
 0xd2b   : > { %1192 = vrot.lane.b32.xlu2 %v1187_v36, %s2532_s21  ;;  %s1416_s21 = sld [smem:[#allocation2 + %s2413_s1]] }
 0xd31   : > { %p1419_p0 = scmp.gt.s32.totalorder %s1418_s20, %s1416_s21 }
 0xd32   : > { %v1131_v31 = vpop.f32.mrf.mxu1  ;;  %v1189_v37 = vpop.f32.mrf.mxu0 }
 0xd33   : > { %s1420_s29 = scalar_select %p1419_p0, %s1418_s20, %s1416_s21 }
 0xd34   : > { %s1421_s23 = scalar_select %p1419_p0, 1, 0 }
 0xd35   : > { %p1424_p1 = scmp.gt.s32.totalorder %s1423_s26, %s1420_s29  ;;  %s1980_s20 = scalar_lea.hbm %s2496_s18, 2 }
 0xd37   : > { %s2541_s26 = smov (!%p1424_p1, %s1423_s26), %s1420_s29  ;;  %s2547_s23 = smov (%p1424_p1, %s1421_s23), 2 }
 0xd38   : > { %p1429_p2 = scmp.gt.s32.totalorder %s1428_s25, %s2541_s26  ;;  %s1448_s29 = sld [smem:[#allocation2 + %s1447_s6]] }
 0xd3a   : > { %v1133_v38 = vpop.f32.mrf.mxu1  ;;  %s2543_s25 = smov (!%p1429_p2, %s1428_s25), %s2541_s26  ;;  %s2549_s23 = smov (%p1429_p2, %s2547_s23), 3 }
 0xd3b   : > { %p1434_p3 = scmp.gt.s32.totalorder %s1433_s27, %s2543_s25  ;;  %v1908_v38 = vld [vmem:[%s2492_s14 + $0x1] ss:$0 sm:$0xff] }
 0xd3d   : > { %s2545_s27 = smov (!%p1434_p3, %s1433_s27), %s2543_s25  ;;  %s2553_s23 = smov (%p1434_p3, %s2549_s23), 4 }
 0xd3e   : > { %p1439_p4 = scmp.gt.s32.totalorder %s1438_s4, %s2545_s27 }
 0xd40   : > { %s2551_s4 = smov (!%p1439_p4, %s1438_s4), %s2545_s27  ;;  %s2555_s23 = smov (%p1439_p4, %s2553_s23), 5 }
 0xd41   : > { %p1444_p7 = scmp.gt.s32.totalorder %s1443_s24, %s2551_s4 }
 0xd43   : > { %s2557_s24 = smov (!%p1444_p7, %s1443_s24), %s2551_s4  ;;  %s2559_s23 = smov (%p1444_p7, %s2555_s23), 6 }
 0xd44   : > { %p1449_p8 = scmp.gt.s32.totalorder %s1448_s29, %s2557_s24  ;;  %s1548_s24 = scalar_lea.hbm %s2496_s18, %s2154_s0 }
 0xd45   : > { %s579_s29 = scalar_lea.vmem [#allocation5], %s578_s22  ;;  %s1552_s3 = sshll.u32 %s1548_s24, 4  ;;  %s1553_s3 = int_to_ptr.hbm [resolvable:$true] %s1552_s3 }
 0xd46   : > { %s2561_s23 = smov (%p1449_p8, %s2559_s23), 7  ;;  %s1550_s26 = sshll.u32 %s579_s29, 4  ;;  %s1551_s26 = int_to_ptr.vmem [resolvable:$true] %s1550_s26 }
 0xd47   : > { %v1451_v39 = vstv %s2561_s23  ;;  %s1540_s4 = scalar_lea.sflag [#allocation3], %s578_s22  ;;  %s1974_s5 = sshra.s32 %s1553_s3, 4  ;;  %s1975_s5 = int_to_ptr.hbm [resolvable:$true] %s1974_s5 }
 0xd48   : > { %vm1452_vm12 = vcmp.eq.s32.totalorder %v2226_v49, %v1451_v39  ;;  %v1833_v49 = vld [vmem:[%s2495_s17 + $0x8] sm:$0xff]  ;;  %s1976_s6 = scalar_lea.hbm %s1975_s5, 1  ;;  %p1981_p12 = scmp.lt.s32.totalorder %s1975_s5, %s2496_s18 }
 0xd49   : > { %1531 = vmatpush.bf16.msra.mxu1 %v1833_v49  ;;  %p1977_p9 = scmp.ne.s32.totalorder %s1975_s5, %s1976_s6  ;;  %p1982_p13 = scmp.lt.s32.totalorder %s1980_s20, %s1976_s6 }
 0xd4b   : > { %p1978_p10 = pnand %p1977_p9, %p2171_p5  ;;  %p1983_p0 = por %p1982_p13, %p1981_p12 }
 0xd4d   : > { %p1979_p11 = pneg %p1978_p10 }
 0xd4f   : > { %p1984_p1 = pnand %p1983_p0, %p1979_p11 }
 0xd85   : > { %v1193_v2 = vpop.permute.xlu2 %1192 }
 0xd86   : > { %v1195_v40 = vsel %vm677_vm6, %v1131_v31, %v1193_v2 }
 0xd87   : > { %v1196_v41 = vpack.c.bf16 %v1195_v40, %v1195_v40 }
 0xd89   : > { %1723 = vmatmul.msk.bf16.vlgmr.msrb.gmra.mxu1 %vm596_vm0, %v1196_v41 }
 0xe06   : > { %v1231_v43 = vpop.f32.mrf.mxu1 }
 0xe07   : > { %v1232_v44 = vadd.f32 %v1904_v42, %v1231_v43  ;;  %v2037_v42 = vmov 0.0  }
 0xe08   : > { %v1791_v43 = vsel %vm1452_vm12, 1.0, %v2037_v42 }
 0xe09   : > { %v2364_v45 = vadd.f32 %v1232_v44, %v2308_v27  ;;  %v1822_v27 = vld [vmem:[%s2489_s11 + $0x10] sm:$0xff] }
 0xe0a   : > { %1303 = vmatpush.bf16.msrb.mxu3 %v1822_v27 }
 0xe0b   : > { %v1240_v46 = vsel %vm596_vm0, %v2364_v45, 0.0 }
 0xe0c   : > { %1241 = vadd.xlane.f32.xlu0 %v1240_v46 }
 0xe0e   : > { %v1233_v47 = vpop.f32.mrf.mxu1 }
 0xe7f   : > { %v1242_v48 = vpop.xlane.xlu0 %1241 }
 0xe80   : > { %v1243_v50 = vmul.f32 %v1242_v48, %v2197_v10 }
 0xe82   : > { %v1244_v52 = vsub.f32 %v2364_v45, %v1243_v50 }
 0xe84   : > { %v1245_v53 = vmul.f32 %v1244_v52, %v1244_v52 }
 0xe86   : > { %v1246_v54 = vsel %vm596_vm0, %v1245_v53, 0.0 }
 0xe87   : > { %1247 = vadd.xlane.f32.xlu1 %v1246_v54 }
 0xefa   : > { %v1248_v56 = vpop.xlane.xlu1 %1247 }
 0xefb   : > { %v1249_v57 = vmul.f32 %v1248_v56, %v2197_v10 }
 0xefd   : > { %v1250_v58 = vadd.f32 1e-05, %v1249_v57 }
 0xeff   : > { %1937 = vrsqrt.f32 %v1250_v58  ;;  %vm1257_vm5 = vweird.f32 %v1250_v58 }
 0xf05   : > { %v1938_v59 = vpop.eup %1937 }
 0xf06   : > { %v1252_v60 = vmul.f32 %v1938_v59, %v1250_v58  ;;  %vm1258_vm4 = vweird.f32 %v1938_v59 }
 0xf07   : > { %vm1259_vm6 = vmor %vm1257_vm5, %vm1258_vm4 }
 0xf08   : > { %v1253_v61 = vmul.f32 %v1938_v59, %v1252_v60 }
 0xf0a   : > { %v1254_v62 = vmul.f32 0.5, %v1253_v61 }
 0xf0c   : > { %v1255_v63 = vsub.f32 1.5, %v1254_v62 }
 0xf0e   : > { %v1256_v0 = vmul.f32 %v1938_v59, %v1255_v63  ;;  %v1478_v63 = vld [vmem:[%s2493_s15] sm:$0x1] }
 0xf10   : > { %v1260_v3 = vsel %vm1259_vm6, %v1938_v59, %v1256_v0 }
 0xf11   : > { %v1261_v4 = vmul.f32 %v1260_v3, %v1244_v52 }
 0xf13   : > { %v1265_v6 = vmul.f32 %v1905_v1, %v1261_v4 }
 0xf15   : > { %v1269_v7 = vadd.f32 %v1906_v5, %v1265_v6 }
 0xf17   : > { %v1270_v8 = vpack.c.bf16 %v1269_v7, %v1269_v7 }
 0xf19   : > { %1739 = vmatmul.msk.bf16.vlgmr.msrb.gmra.mxu3 %vm596_vm0, %v1270_v8 }
 0xf9c   : > { %v1305_v18 = vpop.f32.mrf.mxu3 }
 0xf9d   : > { %v1306_v20 = vadd.f32 %v1907_v17, %v1305_v18 }
 0xf9f   : > { %v1740_v21 = vmul.f32 -1.702, %v1306_v20 }
 0xfa1   : > { %v1311_v51 = vmul.f32 1.442695, %v1740_v21 }
 0xfa3   : > { %1939 = vpow2.f32 %v1311_v51 }
 0xfa4   : > { %v1307_v22 = vpop.f32.mrf.mxu3 }
 0xfa9   : > { %v1940_v23 = vpop.eup %1939 }
 0xfaa   : > { %v1313_v24 = vadd.f32 1.0, %v1940_v23 }
 0xfac   : > { %1941 = vrcp.f32 %v1313_v24  ;;  %v1325_v29 = vand.u32 2147483648, %v1313_v24  ;;  %v1323_v32 = vand.u32 2147483647, %v1313_v24  ;;  %vm1319_vm9 = vweird.f32 %v1313_v24 }
 0xfae   : > { %v1326_v34 = vor.u32 1.1754944e-38, %v1325_v29  ;;  %vm1324_vm11 = vcmp.eq.f32.partialorder %v1323_v32, 8.507059e+37 }
 0xfb2   : > { %v1942_v25 = vpop.eup %1941 }
 0xfb3   : > { %v1315_v26 = vmul.f32 %v1942_v25, %v1313_v24  ;;  %vm1320_vm7 = vweird.f32 %v1942_v25 }
 0xfb4   : > { %vm1321_vm10 = vmor %vm1319_vm9, %vm1320_vm7 }
 0xfb5   : > { %v1316_v28 = vsub.f32 1.0, %v1315_v26 }
 0xfb7   : > { %v1317_v30 = vmul.f32 %v1942_v25, %v1316_v28 }
 0xfb9   : > { %v1318_v33 = vadd.f32 %v1942_v25, %v1317_v30 }
 0xfbb   : > { %v1322_v35 = vsel %vm1321_vm10, %v1942_v25, %v1318_v33 }
 0xfbc   : > { %v1327_v36 = vsel %vm1324_vm11, %v1326_v34, %v1322_v35 }
 0xfbd   : > { %v1329_v31 = vmul.f32 %v1327_v36, %v1306_v20 }
 0xfbf   : > { %v1330_v37 = vpack.c.bf16 %v1329_v31, %v1329_v31 }
 0xfc1   : > { %1409 = vmatmul.bf16.vlgmr.msrb.gmra.mxu2 %v1330_v37 }
0x1044   : > { %v1410_v2 = vpop.f32.mrf.mxu2 }
0x1045   : > { %v1411_v40 = vadd.f32 %v1908_v38, %v1410_v2 }
0x1047   : > { %v1414_v41 = vadd.f32 %v1411_v40, %v2364_v45  ;;  %v1832_v45 = vld [vmem:[%s2495_s17] sm:$0xff] }
0x1048   : > { %1532 = vmatpush.bf16.msra.mxu1 %v1832_v45 }
0x1049   : > { %1473 = vmatpush.msra.mxu0 %v1414_v41 }
0x104a   : > { %1792 = vmatmul.msk.f32.vlgmr.msra.gmra.mxu0 %vm697_vm8, %v1791_v43 }
0x104c   : > { %v1412_v44 = vpop.f32.mrf.mxu2 }
0x10c7   : > { %v1475_v46 = vpop.f32.mrf.mxu0 }
0x10c8   : > { %v1481_v47 = vsel %vm1480_vm13, %v1475_v46, 0.0 }
0x10c9   : > { %1482 = vadd.xlane.f32.xlu0 %v1481_v47 }
0x113c   : > { %v1483_v48 = vpop.xlane.xlu0 %1482 }
0x113d   : > { %v1484_v50 = vmul.f32 %v1483_v48, %v2197_v10 }
0x113f   : > { %v1485_v52 = vsub.f32 %v1475_v46, %v1484_v50 }
0x1141   : > { %v1486_v53 = vmul.f32 %v1485_v52, %v1485_v52 }
0x1143   : > { %v1487_v54 = vsel %vm1480_vm13, %v1486_v53, 0.0 }
0x1144   : > { %1488 = vadd.xlane.f32.xlu0 %v1487_v54 }
0x11b7   : > { %v1489_v55 = vpop.xlane.xlu0 %1488 }
0x11b8   : > { %v1490_v27 = vmul.f32 %v1489_v55, %v2197_v10  ;;  %v1479_v10 = vld [vmem:[%s2494_s16] sm:$0x1] }
0x11ba   : > { %v1491_v56 = vadd.f32 1e-05, %v1490_v27 }
0x11bc   : > { %1943 = vrsqrt.f32 %v1491_v56  ;;  %vm1498_vm14 = vweird.f32 %v1491_v56 }
0x11c2   : > { %v1944_v57 = vpop.eup %1943 }
0x11c3   : > { %v1493_v58 = vmul.f32 %v1944_v57, %v1491_v56  ;;  %vm1499_vm8 = vweird.f32 %v1944_v57 }
0x11c4   : > { %vm1500_vm15 = vmor %vm1498_vm14, %vm1499_vm8 }
0x11c5   : > { %v1494_v59 = vmul.f32 %v1944_v57, %v1493_v58 }
0x11c7   : > { %v1495_v60 = vmul.f32 0.5, %v1494_v59 }
0x11c9   : > { %v1496_v61 = vsub.f32 1.5, %v1495_v60 }
0x11cb   : > { %v1497_v62 = vmul.f32 %v1944_v57, %v1496_v61 }
0x11cd   : > { %v1501_v0 = vsel %vm1500_vm15, %v1944_v57, %v1497_v62 }
0x11ce   : > { %v1502_v1 = vmul.f32 %v1501_v0, %v1485_v52 }
0x11d0   : > { %v1503_v3 = vmul.f32 %v1502_v1, %v1478_v63 }
0x11d2   : > { %v1504_v4 = vadd.f32 %v1503_v3, %v1479_v10 }
0x11d4   : > { %v1505_v5 = vpack.c.bf16 %v1504_v4, %v1504_v4 }
0x11d6   : > { %1801 = vmatmul.msk.bf16.vlgmr.msra.gmra.mxu1 %vm596_vm0, %v1505_v5 }
0x1253   : > { %v1534_v6 = vpop.f32.mrf.mxu1 }
0x1254   : > { %1538 = vst [vmem:[%s579_s29] sm:$0x1] %v1534_v6 }
0x1255   : > { %1987 = shalt.err (!%p1984_p1)
}
0x1256   : > { %1838 = dma.vmem_to_hbm [thread:$0]  (%p2171_p5), %s1551_s26, 16, %s1553_s3, %s1540_s4  }
0x125b   : > { %v1536_v7 = vpop.f32.mrf.mxu1 }
0x125c PF: > { %s2533_s25 = sld [smem:[#allocation8_spill]]  ;;  %p1850_p2 = scmp.ge.s32.totalorder %s2026_s30, 2 }
0x125e   : > { %p1845_p3 = pnand %p1850_p2, %p2175_p6 }
0x1260   : > { %p1846_p4 = pneg %p1845_p3 }
0x1262   : > { %s1564_s27 = sand.u32 1, %s2533_s25  }
0x1263   : > { %s1565_s23 = scalar_lea.sflag [#allocation3], %s1564_s27 }
0x1264   : > { %2009 = dma.done.wait (%p1846_p4), %s1565_s23, 16  }
0x1265   : > { %2011 = vsyncadd (%p1846_p4), %s1565_s23, 4294967280  ;;  %s2535_s30 = sld [smem:[#allocation10_spill]]  ;;  %s2538_s27 = smov %s2018_s28 }
0x1266   : > { %s2536_s24 = sld [smem:[#allocation9_spill]] }
0x1267   : > { %s2537_s29 = sld [smem:[#allocation11_spill]] }
0x126b   : > { %p29_p7 = scmp.ge.s32.totalorder %s2535_s30, 4  }
0x126c   : > { %s2539_s28 = smov %s2536_s24 }
0x126d   :  { %31 = sbr.rel (!%p29_p7) target bundleno = 12 (0xc), region = 144 }
0x1272   :  { %1570 = vsyncpa [#allocation3], 1 }
0x1273   :  { %1572 = vsyncpa [#allocation3 + $0x1], 1 }
0x1274   :  { %1573 = vsyncpa [#allocation4], 1 }
0x1275   :  { %1575 = vsyncpa [#allocation4 + $0x1], 1 }

</bundles_post_ra>
